<compile_context>
chip_gen: v6e
topology: v6e:2x2x1
jax: 0.10.0
libtpu: 0.0.40
codegen_flags: <defaults>
</compile_context>

<pallas_src>
import functools

import jax
import jax.numpy as jnp
from jax.experimental import pallas as pl
from jax.experimental.pallas import tpu as pltpu

_LANES = 128
_SUBLANES = 8
_UNROLL_GATHER_LIMIT = 128   # fully unroll the gather when tb * C <= this


def _round_up(x: int, m: int) -> int:
    return (x + m - 1) // m * m


def _vmem_footprint_bytes(shape, dtype) -> int:
    """VMEM bytes of an array after (sublane, lane) tile padding of the last two dims."""
    itemsize = jnp.dtype(dtype).itemsize
    packing = max(1, 4 // itemsize)                 # rows per sublane for sub-32-bit
    lead = 1
    for d in shape[:-2]:
        lead *= int(d)
    sub = _round_up(int(shape[-2]) if len(shape) >= 2 else 1, _SUBLANES * packing)
    lane = _round_up(int(shape[-1]), _LANES)
    return lead * sub * lane * itemsize


def _vmem_capacity_bytes() -> int:
    try:
        return int(pltpu.get_tpu_info().vmem_capacity_bytes)
    except Exception:
        return 64 * 1024 * 1024                     # conservative: v7x per-core VMEM


def _pick_batch_tile(batch: int) -> int:
    # Sublane-aligned tiles, big enough to amortize the ~0.35us per-grid-step
    # overhead but small enough to leave >= ~4 grid steps on large batches so
    # the "parallel" grid axis can load-balance across v7x's two TensorCores.
    return max(_SUBLANES, min(64, (batch // 4) // _SUBLANES * _SUBLANES))


# ----------------------------------------------------------------------------
# Path 1: embedding tables resident in VMEM (fast path; taken when they fit).
# ----------------------------------------------------------------------------
def _vmem_table_kernel(uid_ref, iid_ref, utbl_ref, itbl_ref, o_ref,
                       u_buf, i_buf, *, tb, n_cand, unroll):
    """One batch tile: gather rows from VMEM-resident tables, VPU mult+reduce.

    uid_ref  : SMEM (B_pad,)      int32  scalar-prefetched user ids
    iid_ref  : SMEM (B_pad*C,)    int32  scalar-prefetched item ids (flattened)
    utbl_ref : VMEM (n_users, D)  f32    whole user table (resident)
    itbl_ref : VMEM (n_items, D)  f32    whole item table (resident)
    o_ref    : VMEM (tb, C)       f32    output block
    u_buf    : VMEM (tb, D)       f32    gathered user rows
    i_buf    : VMEM (tb, C, D)    f32    gathered item rows
    """
    b0 = pl.program_id(0) * tb

    def gather_row(r):
        u_buf[pl.ds(r, 1), :] = utbl_ref[pl.ds(uid_ref[b0 + r], 1), :]
        base = (b0 + r) * n_cand
        for c in range(n_cand):                     # static unroll over candidates
            i_buf[r, pl.ds(c, 1), :] = itbl_ref[pl.ds(iid_ref[base + c], 1), :]

    if unroll:
        # Small tiles: static offsets everywhere -> best scheduling.
        for r in range(tb):
            gather_row(r)
    else:
        # Large tiles: bounded I-cache / scalar pressure.
        @pl.loop(0, tb)
        def _(r):
            gather_row(r)

    # D < 128: VPU broadcast-multiply + lane reduction (f32 accumulate).  An
    # MXU contraction here would be an M=1 matmul using <= D of 128/256 rows.
    u = u_buf[...]                                   # (tb, D)    f32
    items = i_buf[...]                               # (tb, C, D) f32
    o_ref[...] = jnp.sum(items * u[:, None, :], axis=-1)   # (tb, C) f32


# ----------------------------------------------------------------------------
# Path 2: tables too big for VMEM -> per-row gather DMAs from HBM (fallback).
# ----------------------------------------------------------------------------
def _hbm_gather_kernel(uid_ref, iid_ref, utbl_hbm, itbl_hbm, o_ref,
                       u_buf, i_buf, dma_sems, *, tb, n_cand, unroll):
    del unroll                                       # DMA issue loop stays unrolled
    b0 = pl.program_id(0) * tb

    def u_copy(row, uid):
        return pltpu.make_async_copy(
            utbl_hbm.at[pl.ds(uid, 1)], u_buf.at[pl.ds(row, 1)], dma_sems.at[0])

    def i_copy(row, col, iid):
        return pltpu.make_async_copy(
            itbl_hbm.at[pl.ds(iid, 1)], i_buf.at[row, pl.ds(col, 1)], dma_sems.at[1])

    # Issue every row-gather DMA for this tile, then drain.
    # TODO(synk): double-buffer the gather of tile i+1 behind the compute of
    # tile i (2-slot u_buf/i_buf + per-slot semaphores) if this fallback path
    # ever becomes hot for tables that exceed VMEM.
    for r in range(tb):
        u_copy(r, uid_ref[b0 + r]).start()
        base = (b0 + r) * n_cand
        for c in range(n_cand):
            i_copy(r, c, iid_ref[base + c]).start()
    # Waits reuse row/col-0 descriptors: every copy on a given semaphore moves
    # the same number of bytes, so any same-shaped descriptor drains one copy.
    for r in range(tb):
        u_copy(r, 0).wait()
        for c in range(n_cand):
            i_copy(r, c, 0).wait()

    u = u_buf[...]                                   # (tb, D)    f32
    items = i_buf[...]                               # (tb, C, D) f32
    o_ref[...] = jnp.sum(items * u[:, None, :], axis=-1)


# ----------------------------------------------------------------------------
# Wrapper
# ----------------------------------------------------------------------------
def pallas_score(user_ids, item_ids, user_emb, item_emb, *, batch_tile=None):
    """user_ids (B,) i32, item_ids (B, C) i32, tables (N, D) f32 -> (B, C) f32."""
    B, = user_ids.shape
    _, C = item_ids.shape
    n_users, D = user_emb.shape
    n_items, _ = item_emb.shape

    tb = batch_tile if batch_tile is not None else _pick_batch_tile(B)
    b_pad = _round_up(B, tb)

    # Clamp ids to the valid range (bounds safety), pad batch to the tile.
    uid = jnp.clip(user_ids.astype(jnp.int32), 0, n_users - 1)
    iid = jnp.clip(item_ids.astype(jnp.int32), 0, n_items - 1)
    if b_pad != B:
        uid = jnp.pad(uid, (0, b_pad - B))            # padded rows gather row 0
        iid = jnp.pad(iid, ((0, b_pad - B), (0, 0)))
    # 1-D SMEM layout: a 2-D (B, C) SMEM array would pad C up to 128 words.
    # TODO(synk): very large B*C id sets would need chunked (per-tile) prefetch.
    iid_flat = iid.reshape(-1)

    # Per-TensorCore VMEM working set (padded footprints).
    table_vmem = (_vmem_footprint_bytes(user_emb.shape, user_emb.dtype)
                  + _vmem_footprint_bytes(item_emb.shape, item_emb.dtype))
    scratch_vmem = (_vmem_footprint_bytes((tb, D), jnp.float32)
                    + _vmem_footprint_bytes((tb, C, D), jnp.float32))
    out_vmem = 2 * _vmem_footprint_bytes((tb, C), jnp.float32)   # double-buffered
    cap = _vmem_capacity_bytes()                      # 64 MiB v7x, 128 MiB v5e/v6e
    needed = table_vmem + scratch_vmem + out_vmem
    tables_resident = (needed + (8 << 20)) <= int(0.75 * cap)

    kernel_kwargs = dict(tb=tb, n_cand=C, unroll=(tb * C) <= _UNROLL_GATHER_LIMIT)
    common_scratch = [pltpu.VMEM((tb, D), jnp.float32),
                      pltpu.VMEM((tb, C, D), jnp.float32)]

    if tables_resident:
        kernel = functools.partial(_vmem_table_kernel, **kernel_kwargs)
        table_specs = [pl.BlockSpec(memory_space=pltpu.MemorySpace.VMEM),
                       pl.BlockSpec(memory_space=pltpu.MemorySpace.VMEM)]
        scratch_shapes = common_scratch
    else:
        kernel = functools.partial(_hbm_gather_kernel, **kernel_kwargs)
        table_specs = [pl.BlockSpec(memory_space=pl.ANY),
                       pl.BlockSpec(memory_space=pl.ANY)]
        scratch_shapes = common_scratch + [pltpu.SemaphoreType.DMA((2,))]

    # Generation-aware scoped-VMEM limit: enough for the resident tables plus
    # margin, never above physical capacity, never below the 32 MiB default.
    vmem_limit = int(max(32 << 20, min(cap - (4 << 20), needed + (24 << 20))))

    emb_bytes = jnp.dtype(user_emb.dtype).itemsize
    scores = pl.pallas_call(
        kernel,
        out_shape=jax.ShapeDtypeStruct((b_pad, C), jnp.float32),
        grid_spec=pltpu.PrefetchScalarGridSpec(
            num_scalar_prefetch=2,                    # user_ids, item_ids -> SMEM
            grid=(b_pad // tb,),
            in_specs=table_specs,
            out_specs=pl.BlockSpec((tb, C), lambda b, u_ids, i_ids: (b, 0)),
            scratch_shapes=scratch_shapes,
        ),
        compiler_params=pltpu.CompilerParams(
            # batch tiles are independent -> shard over v7x's 2 TensorCores
            dimension_semantics=("parallel",),
            vmem_limit_bytes=vmem_limit,
        ),
        cost_estimate=pl.CostEstimate(
            flops=2 * b_pad * C * D,
            transcendentals=0,
            bytes_accessed=(n_users * D + n_items * D) * emb_bytes
                           + b_pad * C * 4 + b_pad * 4 + b_pad * C * 4,
        ),
    )(uid, iid_flat, user_emb, item_emb)
    return scores[:B]


class BaseModelJAX:
    """Minimal concrete realization of BaseModel's prediction contract."""

    def __init__(self, n_users: int, n_items: int, emb_dim: int, key):
        ku, ki = jax.random.split(key)
        # BaseModel.init_weights: Embedding weight ~ N(mean=0.0, std=0.01).
        # Kept f32 like the PyTorch parameters: the kernel keeps the tables
        # VMEM-resident when they fit, so bf16-for-HBM-bandwidth is not needed.
        self.user_emb = 0.01 * jax.random.normal(ku, (n_users, emb_dim), jnp.float32)
        self.item_emb = 0.01 * jax.random.normal(ki, (n_items, emb_dim), jnp.float32)

    def forward(self, feed_dict: dict) -> dict:
        user_ids = feed_dict["user_id"].astype(jnp.int32)     # (B,)
        item_ids = feed_dict["item_id"].astype(jnp.int32)     # (B, C)
        prediction = pallas_score(user_ids, item_ids,
                                  self.user_emb, self.item_emb)   # (B, C) f32
        return {"prediction": prediction}


if __name__ == "__main__":
    key = jax.random.PRNGKey(0)
    k_model, k_user, k_item = jax.random.split(key, 3)

    batch_size, n_candidates, emb_dim = 16, 8, 32
    n_users, n_items = 64, 256

    model = BaseModelJAX(n_users, n_items, emb_dim, k_model)

    feed_dict = {
        "user_id": jax.random.randint(k_user, (batch_size,), 0, n_users,
                                      jnp.int32),
        "item_id": jax.random.randint(k_item, (batch_size, n_candidates), 0,
                                      n_items, jnp.int32),
        "batch_size": batch_size,
        "phase": "test",
    }

    out_dict = model.forward(feed_dict)
    pred = jax.block_until_ready(out_dict["prediction"])
    assert pred.shape == (batch_size, n_candidates)
    assert pred.dtype == jnp.float32

    # correctness check against a plain-JAX reference (gather + einsum)
    u = jnp.take(model.user_emb, feed_dict["user_id"], axis=0)
    it = jnp.take(model.item_emb, feed_dict["item_id"], axis=0)
    ref = jnp.einsum("bd,bcd->bc", u, it)
    assert jnp.allclose(pred, ref, atol=1e-5, rtol=1e-3), "mismatch vs reference"

    print("KERNEL_OK")
</pallas_src>

<mosaic_0001>
module attributes {stable_mosaic.version = 11 : i64} {
  func.func @_vmem_table_kernel(%arg0: i32, %arg1: memref<16xi32, #tpu.memory_space<smem>>, %arg2: memref<128xi32, #tpu.memory_space<smem>>, %arg3: memref<64x32xf32, #tpu.memory_space<vmem>>, %arg4: memref<256x32xf32, #tpu.memory_space<vmem>>, %arg5: memref<8x8xf32, #tpu.memory_space<vmem>>, %arg6: memref<8x32xf32, #tpu.memory_space<vmem>>, %arg7: memref<8x8x32xf32, #tpu.memory_space<vmem>>) attributes {dimension_semantics = [#tpu.dimension_semantics<parallel>], iteration_bounds = array<i64: 2>, scalar_prefetch = 2 : i64, scratch_operands = 2 : i64, tpu.core_type = #tpu.core_type<tc>, window_params = [{pipeline_mode = #tpu.pipeline_mode<synchronous>, transform_indices = @transform_0, window_bounds = array<i64: 64, 32>}, {pipeline_mode = #tpu.pipeline_mode<synchronous>, transform_indices = @transform_1, window_bounds = array<i64: 256, 32>}, {transform_indices = @transform_2, window_bounds = array<i64: 8, 8>}]} {
    %c8_i32 = arith.constant 8 : i32
    %0 = arith.muli %arg0, %c8_i32 : i32
    %c0_i32 = arith.constant 0 : i32
    %1 = arith.addi %0, %c0_i32 : i32
    %2 = arith.index_cast %1 : i32 to index
    %3 = memref.load %arg1[%2] : memref<16xi32, #tpu.memory_space<smem>>
    %4 = arith.index_cast %3 : i32 to index
    %c0 = arith.constant 0 : index
    %5 = vector.load %arg3[%4, %c0] : memref<64x32xf32, #tpu.memory_space<vmem>>, vector<1x32xf32>
    %c0_0 = arith.constant 0 : index
    %c0_1 = arith.constant 0 : index
    %6 = vector.load %arg6[%c0_0, %c0_1] : memref<8x32xf32, #tpu.memory_space<vmem>>, vector<1x32xf32>
    tpu.vector_store %arg6[%c0_0, %c0_1], %5 {strides = array<i32>} : memref<8x32xf32, #tpu.memory_space<vmem>>, vector<1x32xf32>,
    %c0_i32_2 = arith.constant 0 : i32
    %7 = arith.addi %0, %c0_i32_2 : i32
    %c8_i32_3 = arith.constant 8 : i32
    %8 = arith.muli %7, %c8_i32_3 : i32
    %c0_i32_4 = arith.constant 0 : i32
    %9 = arith.addi %8, %c0_i32_4 : i32
    %10 = arith.index_cast %9 : i32 to index
    %11 = memref.load %arg2[%10] : memref<128xi32, #tpu.memory_space<smem>>
    %12 = arith.index_cast %11 : i32 to index
    %c0_5 = arith.constant 0 : index
    %13 = vector.load %arg4[%12, %c0_5] : memref<256x32xf32, #tpu.memory_space<vmem>>, vector<1x32xf32>
    %c0_6 = arith.constant 0 : index
    %c0_7 = arith.constant 0 : index
    %c0_8 = arith.constant 0 : index
    %14 = vector.load %arg7[%c0_6, %c0_7, %c0_8] : memref<8x8x32xf32, #tpu.memory_space<vmem>>, vector<1x1x32xf32>
    %15 = vector.shape_cast %14 : vector<1x1x32xf32> to vector<1x32xf32>
    %16 = vector.shape_cast %13 : vector<1x32xf32> to vector<1x1x32xf32>
    tpu.vector_store %arg7[%c0_6, %c0_7, %c0_8], %16 {strides = array<i32>} : memref<8x8x32xf32, #tpu.memory_space<vmem>>, vector<1x1x32xf32>,
    %c1_i32 = arith.constant 1 : i32
    %17 = arith.addi %8, %c1_i32 : i32
    %18 = arith.index_cast %17 : i32 to index
    %19 = memref.load %arg2[%18] : memref<128xi32, #tpu.memory_space<smem>>
    %20 = arith.index_cast %19 : i32 to index
    %c0_9 = arith.constant 0 : index
    %21 = vector.load %arg4[%20, %c0_9] : memref<256x32xf32, #tpu.memory_space<vmem>>, vector<1x32xf32>
    %c0_10 = arith.constant 0 : index
    %c1 = arith.constant 1 : index
    %c0_11 = arith.constant 0 : index
    %22 = vector.load %arg7[%c0_10, %c1, %c0_11] : memref<8x8x32xf32, #tpu.memory_space<vmem>>, vector<1x1x32xf32>
    %23 = vector.shape_cast %22 : vector<1x1x32xf32> to vector<1x32xf32>
    %24 = vector.shape_cast %21 : vector<1x32xf32> to vector<1x1x32xf32>
    tpu.vector_store %arg7[%c0_10, %c1, %c0_11], %24 {strides = array<i32>} : memref<8x8x32xf32, #tpu.memory_space<vmem>>, vector<1x1x32xf32>,
    %c2_i32 = arith.constant 2 : i32
    %25 = arith.addi %8, %c2_i32 : i32
    %26 = arith.index_cast %25 : i32 to index
    %27 = memref.load %arg2[%26] : memref<128xi32, #tpu.memory_space<smem>>
    %28 = arith.index_cast %27 : i32 to index
    %c0_12 = arith.constant 0 : index
    %29 = vector.load %arg4[%28, %c0_12] : memref<256x32xf32, #tpu.memory_space<vmem>>, vector<1x32xf32>
    %c0_13 = arith.constant 0 : index
    %c2 = arith.constant 2 : index
    %c0_14 = arith.constant 0 : index
    %30 = vector.load %arg7[%c0_13, %c2, %c0_14] : memref<8x8x32xf32, #tpu.memory_space<vmem>>, vector<1x1x32xf32>
    %31 = vector.shape_cast %30 : vector<1x1x32xf32> to vector<1x32xf32>
    %32 = vector.shape_cast %29 : vector<1x32xf32> to vector<1x1x32xf32>
    tpu.vector_store %arg7[%c0_13, %c2, %c0_14], %32 {strides = array<i32>} : memref<8x8x32xf32, #tpu.memory_space<vmem>>, vector<1x1x32xf32>,
    %c3_i32 = arith.constant 3 : i32
    %33 = arith.addi %8, %c3_i32 : i32
    %34 = arith.index_cast %33 : i32 to index
    %35 = memref.load %arg2[%34] : memref<128xi32, #tpu.memory_space<smem>>
    %36 = arith.index_cast %35 : i32 to index
    %c0_15 = arith.constant 0 : index
    %37 = vector.load %arg4[%36, %c0_15] : memref<256x32xf32, #tpu.memory_space<vmem>>, vector<1x32xf32>
    %c0_16 = arith.constant 0 : index
    %c3 = arith.constant 3 : index
    %c0_17 = arith.constant 0 : index
    %38 = vector.load %arg7[%c0_16, %c3, %c0_17] : memref<8x8x32xf32, #tpu.memory_space<vmem>>, vector<1x1x32xf32>
    %39 = vector.shape_cast %38 : vector<1x1x32xf32> to vector<1x32xf32>
    %40 = vector.shape_cast %37 : vector<1x32xf32> to vector<1x1x32xf32>
    tpu.vector_store %arg7[%c0_16, %c3, %c0_17], %40 {strides = array<i32>} : memref<8x8x32xf32, #tpu.memory_space<vmem>>, vector<1x1x32xf32>,
    %c4_i32 = arith.constant 4 : i32
    %41 = arith.addi %8, %c4_i32 : i32
    %42 = arith.index_cast %41 : i32 to index
    %43 = memref.load %arg2[%42] : memref<128xi32, #tpu.memory_space<smem>>
    %44 = arith.index_cast %43 : i32 to index
    %c0_18 = arith.constant 0 : index
    %45 = vector.load %arg4[%44, %c0_18] : memref<256x32xf32, #tpu.memory_space<vmem>>, vector<1x32xf32>
    %c0_19 = arith.constant 0 : index
    %c4 = arith.constant 4 : index
    %c0_20 = arith.constant 0 : index
    %46 = vector.load %arg7[%c0_19, %c4, %c0_20] : memref<8x8x32xf32, #tpu.memory_space<vmem>>, vector<1x1x32xf32>
    %47 = vector.shape_cast %46 : vector<1x1x32xf32> to vector<1x32xf32>
    %48 = vector.shape_cast %45 : vector<1x32xf32> to vector<1x1x32xf32>
    tpu.vector_store %arg7[%c0_19, %c4, %c0_20], %48 {strides = array<i32>} : memref<8x8x32xf32, #tpu.memory_space<vmem>>, vector<1x1x32xf32>,
    %c5_i32 = arith.constant 5 : i32
    %49 = arith.addi %8, %c5_i32 : i32
    %50 = arith.index_cast %49 : i32 to index
    %51 = memref.load %arg2[%50] : memref<128xi32, #tpu.memory_space<smem>>
    %52 = arith.index_cast %51 : i32 to index
    %c0_21 = arith.constant 0 : index
    %53 = vector.load %arg4[%52, %c0_21] : memref<256x32xf32, #tpu.memory_space<vmem>>, vector<1x32xf32>
    %c0_22 = arith.constant 0 : index
    %c5 = arith.constant 5 : index
    %c0_23 = arith.constant 0 : index
    %54 = vector.load %arg7[%c0_22, %c5, %c0_23] : memref<8x8x32xf32, #tpu.memory_space<vmem>>, vector<1x1x32xf32>
    %55 = vector.shape_cast %54 : vector<1x1x32xf32> to vector<1x32xf32>
    %56 = vector.shape_cast %53 : vector<1x32xf32> to vector<1x1x32xf32>
    tpu.vector_store %arg7[%c0_22, %c5, %c0_23], %56 {strides = array<i32>} : memref<8x8x32xf32, #tpu.memory_space<vmem>>, vector<1x1x32xf32>,
    %c6_i32 = arith.constant 6 : i32
    %57 = arith.addi %8, %c6_i32 : i32
    %58 = arith.index_cast %57 : i32 to index
    %59 = memref.load %arg2[%58] : memref<128xi32, #tpu.memory_space<smem>>
    %60 = arith.index_cast %59 : i32 to index
    %c0_24 = arith.constant 0 : index
    %61 = vector.load %arg4[%60, %c0_24] : memref<256x32xf32, #tpu.memory_space<vmem>>, vector<1x32xf32>
    %c0_25 = arith.constant 0 : index
    %c6 = arith.constant 6 : index
    %c0_26 = arith.constant 0 : index
    %62 = vector.load %arg7[%c0_25, %c6, %c0_26] : memref<8x8x32xf32, #tpu.memory_space<vmem>>, vector<1x1x32xf32>
    %63 = vector.shape_cast %62 : vector<1x1x32xf32> to vector<1x32xf32>
    %64 = vector.shape_cast %61 : vector<1x32xf32> to vector<1x1x32xf32>
    tpu.vector_store %arg7[%c0_25, %c6, %c0_26], %64 {strides = array<i32>} : memref<8x8x32xf32, #tpu.memory_space<vmem>>, vector<1x1x32xf32>,
    %c7_i32 = arith.constant 7 : i32
    %65 = arith.addi %8, %c7_i32 : i32
    %66 = arith.index_cast %65 : i32 to index
    %67 = memref.load %arg2[%66] : memref<128xi32, #tpu.memory_space<smem>>
    %68 = arith.index_cast %67 : i32 to index
    %c0_27 = arith.constant 0 : index
    %69 = vector.load %arg4[%68, %c0_27] : memref<256x32xf32, #tpu.memory_space<vmem>>, vector<1x32xf32>
    %c0_28 = arith.constant 0 : index
    %c7 = arith.constant 7 : index
    %c0_29 = arith.constant 0 : index
    %70 = vector.load %arg7[%c0_28, %c7, %c0_29] : memref<8x8x32xf32, #tpu.memory_space<vmem>>, vector<1x1x32xf32>
    %71 = vector.shape_cast %70 : vector<1x1x32xf32> to vector<1x32xf32>
    %72 = vector.shape_cast %69 : vector<1x32xf32> to vector<1x1x32xf32>
    tpu.vector_store %arg7[%c0_28, %c7, %c0_29], %72 {strides = array<i32>} : memref<8x8x32xf32, #tpu.memory_space<vmem>>, vector<1x1x32xf32>,
    %c1_i32_30 = arith.constant 1 : i32
    %73 = arith.addi %0, %c1_i32_30 : i32
    %74 = arith.index_cast %73 : i32 to index
    %75 = memref.load %arg1[%74] : memref<16xi32, #tpu.memory_space<smem>>
    %76 = arith.index_cast %75 : i32 to index
    %c0_31 = arith.constant 0 : index
    %77 = vector.load %arg3[%76, %c0_31] : memref<64x32xf32, #tpu.memory_space<vmem>>, vector<1x32xf32>
    %c1_32 = arith.constant 1 : index
    %c0_33 = arith.constant 0 : index
    %78 = vector.load %arg6[%c1_32, %c0_33] : memref<8x32xf32, #tpu.memory_space<vmem>>, vector<1x32xf32>
    tpu.vector_store %arg6[%c1_32, %c0_33], %77 {strides = array<i32>} : memref<8x32xf32, #tpu.memory_space<vmem>>, vector<1x32xf32>,
    %c1_i32_34 = arith.constant 1 : i32
    %79 = arith.addi %0, %c1_i32_34 : i32
    %c8_i32_35 = arith.constant 8 : i32
    %80 = arith.muli %79, %c8_i32_35 : i32
    %c0_i32_36 = arith.constant 0 : i32
    %81 = arith.addi %80, %c0_i32_36 : i32
    %82 = arith.index_cast %81 : i32 to index
    %83 = memref.load %arg2[%82] : memref<128xi32, #tpu.memory_space<smem>>
    %84 = arith.index_cast %83 : i32 to index
    %c0_37 = arith.constant 0 : index
    %85 = vector.load %arg4[%84, %c0_37] : memref<256x32xf32, #tpu.memory_space<vmem>>, vector<1x32xf32>
    %c1_38 = arith.constant 1 : index
    %c0_39 = arith.constant 0 : index
    %c0_40 = arith.constant 0 : index
    %86 = vector.load %arg7[%c1_38, %c0_39, %c0_40] : memref<8x8x32xf32, #tpu.memory_space<vmem>>, vector<1x1x32xf32>
    %87 = vector.shape_cast %86 : vector<1x1x32xf32> to vector<1x32xf32>
    %88 = vector.shape_cast %85 : vector<1x32xf32> to vector<1x1x32xf32>
    tpu.vector_store %arg7[%c1_38, %c0_39, %c0_40], %88 {strides = array<i32>} : memref<8x8x32xf32, #tpu.memory_space<vmem>>, vector<1x1x32xf32>,
    %c1_i32_41 = arith.constant 1 : i32
    %89 = arith.addi %80, %c1_i32_41 : i32
    %90 = arith.index_cast %89 : i32 to index
    %91 = memref.load %arg2[%90] : memref<128xi32, #tpu.memory_space<smem>>
    %92 = arith.index_cast %91 : i32 to index
    %c0_42 = arith.constant 0 : index
    %93 = vector.load %arg4[%92, %c0_42] : memref<256x32xf32, #tpu.memory_space<vmem>>, vector<1x32xf32>
    %c1_43 = arith.constant 1 : index
    %c1_44 = arith.constant 1 : index
    %c0_45 = arith.constant 0 : index
    %94 = vector.load %arg7[%c1_43, %c1_44, %c0_45] : memref<8x8x32xf32, #tpu.memory_space<vmem>>, vector<1x1x32xf32>
    %95 = vector.shape_cast %94 : vector<1x1x32xf32> to vector<1x32xf32>
    %96 = vector.shape_cast %93 : vector<1x32xf32> to vector<1x1x32xf32>
    tpu.vector_store %arg7[%c1_43, %c1_44, %c0_45], %96 {strides = array<i32>} : memref<8x8x32xf32, #tpu.memory_space<vmem>>, vector<1x1x32xf32>,
    %c2_i32_46 = arith.constant 2 : i32
    %97 = arith.addi %80, %c2_i32_46 : i32
    %98 = arith.index_cast %97 : i32 to index
    %99 = memref.load %arg2[%98] : memref<128xi32, #tpu.memory_space<smem>>
    %100 = arith.index_cast %99 : i32 to index
    %c0_47 = arith.constant 0 : index
    %101 = vector.load %arg4[%100, %c0_47] : memref<256x32xf32, #tpu.memory_space<vmem>>, vector<1x32xf32>
    %c1_48 = arith.constant 1 : index
    %c2_49 = arith.constant 2 : index
    %c0_50 = arith.constant 0 : index
    %102 = vector.load %arg7[%c1_48, %c2_49, %c0_50] : memref<8x8x32xf32, #tpu.memory_space<vmem>>, vector<1x1x32xf32>
    %103 = vector.shape_cast %102 : vector<1x1x32xf32> to vector<1x32xf32>
    %104 = vector.shape_cast %101 : vector<1x32xf32> to vector<1x1x32xf32>
    tpu.vector_store %arg7[%c1_48, %c2_49, %c0_50], %104 {strides = array<i32>} : memref<8x8x32xf32, #tpu.memory_space<vmem>>, vector<1x1x32xf32>,
    %c3_i32_51 = arith.constant 3 : i32
    %105 = arith.addi %80, %c3_i32_51 : i32
    %106 = arith.index_cast %105 : i32 to index
    %107 = memref.load %arg2[%106] : memref<128xi32, #tpu.memory_space<smem>>
    %108 = arith.index_cast %107 : i32 to index
    %c0_52 = arith.constant 0 : index
    %109 = vector.load %arg4[%108, %c0_52] : memref<256x32xf32, #tpu.memory_space<vmem>>, vector<1x32xf32>
    %c1_53 = arith.constant 1 : index
    %c3_54 = arith.constant 3 : index
    %c0_55 = arith.constant 0 : index
    %110 = vector.load %arg7[%c1_53, %c3_54, %c0_55] : memref<8x8x32xf32, #tpu.memory_space<vmem>>, vector<1x1x32xf32>
    %111 = vector.shape_cast %110 : vector<1x1x32xf32> to vector<1x32xf32>
    %112 = vector.shape_cast %109 : vector<1x32xf32> to vector<1x1x32xf32>
    tpu.vector_store %arg7[%c1_53, %c3_54, %c0_55], %112 {strides = array<i32>} : memref<8x8x32xf32, #tpu.memory_space<vmem>>, vector<1x1x32xf32>,
    %c4_i32_56 = arith.constant 4 : i32
    %113 = arith.addi %80, %c4_i32_56 : i32
    %114 = arith.index_cast %113 : i32 to index
    %115 = memref.load %arg2[%114] : memref<128xi32, #tpu.memory_space<smem>>
    %116 = arith.index_cast %115 : i32 to index
    %c0_57 = arith.constant 0 : index
    %117 = vector.load %arg4[%116, %c0_57] : memref<256x32xf32, #tpu.memory_space<vmem>>, vector<1x32xf32>
    %c1_58 = arith.constant 1 : index
    %c4_59 = arith.constant 4 : index
    %c0_60 = arith.constant 0 : index
    %118 = vector.load %arg7[%c1_58, %c4_59, %c0_60] : memref<8x8x32xf32, #tpu.memory_space<vmem>>, vector<1x1x32xf32>
    %119 = vector.shape_cast %118 : vector<1x1x32xf32> to vector<1x32xf32>
    %120 = vector.shape_cast %117 : vector<1x32xf32> to vector<1x1x32xf32>
    tpu.vector_store %arg7[%c1_58, %c4_59, %c0_60], %120 {strides = array<i32>} : memref<8x8x32xf32, #tpu.memory_space<vmem>>, vector<1x1x32xf32>,
    %c5_i32_61 = arith.constant 5 : i32
    %121 = arith.addi %80, %c5_i32_61 : i32
    %122 = arith.index_cast %121 : i32 to index
    %123 = memref.load %arg2[%122] : memref<128xi32, #tpu.memory_space<smem>>
    %124 = arith.index_cast %123 : i32 to index
    %c0_62 = arith.constant 0 : index
    %125 = vector.load %arg4[%124, %c0_62] : memref<256x32xf32, #tpu.memory_space<vmem>>, vector<1x32xf32>
    %c1_63 = arith.constant 1 : index
    %c5_64 = arith.constant 5 : index
    %c0_65 = arith.constant 0 : index
    %126 = vector.load %arg7[%c1_63, %c5_64, %c0_65] : memref<8x8x32xf32, #tpu.memory_space<vmem>>, vector<1x1x32xf32>
    %127 = vector.shape_cast %126 : vector<1x1x32xf32> to vector<1x32xf32>
    %128 = vector.shape_cast %125 : vector<1x32xf32> to vector<1x1x32xf32>
    tpu.vector_store %arg7[%c1_63, %c5_64, %c0_65], %128 {strides = array<i32>} : memref<8x8x32xf32, #tpu.memory_space<vmem>>, vector<1x1x32xf32>,
    %c6_i32_66 = arith.constant 6 : i32
    %129 = arith.addi %80, %c6_i32_66 : i32
    %130 = arith.index_cast %129 : i32 to index
    %131 = memref.load %arg2[%130] : memref<128xi32, #tpu.memory_space<smem>>
    %132 = arith.index_cast %131 : i32 to index
    %c0_67 = arith.constant 0 : index
    %133 = vector.load %arg4[%132, %c0_67] : memref<256x32xf32, #tpu.memory_space<vmem>>, vector<1x32xf32>
    %c1_68 = arith.constant 1 : index
    %c6_69 = arith.constant 6 : index
    %c0_70 = arith.constant 0 : index
    %134 = vector.load %arg7[%c1_68, %c6_69, %c0_70] : memref<8x8x32xf32, #tpu.memory_space<vmem>>, vector<1x1x32xf32>
    %135 = vector.shape_cast %134 : vector<1x1x32xf32> to vector<1x32xf32>
    %136 = vector.shape_cast %133 : vector<1x32xf32> to vector<1x1x32xf32>
    tpu.vector_store %arg7[%c1_68, %c6_69, %c0_70], %136 {strides = array<i32>} : memref<8x8x32xf32, #tpu.memory_space<vmem>>, vector<1x1x32xf32>,
    %c7_i32_71 = arith.constant 7 : i32
    %137 = arith.addi %80, %c7_i32_71 : i32
    %138 = arith.index_cast %137 : i32 to index
    %139 = memref.load %arg2[%138] : memref<128xi32, #tpu.memory_space<smem>>
    %140 = arith.index_cast %139 : i32 to index
    %c0_72 = arith.constant 0 : index
    %141 = vector.load %arg4[%140, %c0_72] : memref<256x32xf32, #tpu.memory_space<vmem>>, vector<1x32xf32>
    %c1_73 = arith.constant 1 : index
    %c7_74 = arith.constant 7 : index
    %c0_75 = arith.constant 0 : index
    %142 = vector.load %arg7[%c1_73, %c7_74, %c0_75] : memref<8x8x32xf32, #tpu.memory_space<vmem>>, vector<1x1x32xf32>
    %143 = vector.shape_cast %142 : vector<1x1x32xf32> to vector<1x32xf32>
    %144 = vector.shape_cast %141 : vector<1x32xf32> to vector<1x1x32xf32>
    tpu.vector_store %arg7[%c1_73, %c7_74, %c0_75], %144 {strides = array<i32>} : memref<8x8x32xf32, #tpu.memory_space<vmem>>, vector<1x1x32xf32>,
    %c2_i32_76 = arith.constant 2 : i32
    %145 = arith.addi %0, %c2_i32_76 : i32
    %146 = arith.index_cast %145 : i32 to index
    %147 = memref.load %arg1[%146] : memref<16xi32, #tpu.memory_space<smem>>
    %148 = arith.index_cast %147 : i32 to index
    %c0_77 = arith.constant 0 : index
    %149 = vector.load %arg3[%148, %c0_77] : memref<64x32xf32, #tpu.memory_space<vmem>>, vector<1x32xf32>
    %c2_78 = arith.constant 2 : index
    %c0_79 = arith.constant 0 : index
    %150 = vector.load %arg6[%c2_78, %c0_79] : memref<8x32xf32, #tpu.memory_space<vmem>>, vector<1x32xf32>
    tpu.vector_store %arg6[%c2_78, %c0_79], %149 {strides = array<i32>} : memref<8x32xf32, #tpu.memory_space<vmem>>, vector<1x32xf32>,
    %c2_i32_80 = arith.constant 2 : i32
    %151 = arith.addi %0, %c2_i32_80 : i32
    %c8_i32_81 = arith.constant 8 : i32
    %152 = arith.muli %151, %c8_i32_81 : i32
    %c0_i32_82 = arith.constant 0 : i32
    %153 = arith.addi %152, %c0_i32_82 : i32
    %154 = arith.index_cast %153 : i32 to index
    %155 = memref.load %arg2[%154] : memref<128xi32, #tpu.memory_space<smem>>
    %156 = arith.index_cast %155 : i32 to index
    %c0_83 = arith.constant 0 : index
    %157 = vector.load %arg4[%156, %c0_83] : memref<256x32xf32, #tpu.memory_space<vmem>>, vector<1x32xf32>
    %c2_84 = arith.constant 2 : index
    %c0_85 = arith.constant 0 : index
    %c0_86 = arith.constant 0 : index
    %158 = vector.load %arg7[%c2_84, %c0_85, %c0_86] : memref<8x8x32xf32, #tpu.memory_space<vmem>>, vector<1x1x32xf32>
    %159 = vector.shape_cast %158 : vector<1x1x32xf32> to vector<1x32xf32>
    %160 = vector.shape_cast %157 : vector<1x32xf32> to vector<1x1x32xf32>
    tpu.vector_store %arg7[%c2_84, %c0_85, %c0_86], %160 {strides = array<i32>} : memref<8x8x32xf32, #tpu.memory_space<vmem>>, vector<1x1x32xf32>,
    %c1_i32_87 = arith.constant 1 : i32
    %161 = arith.addi %152, %c1_i32_87 : i32
    %162 = arith.index_cast %161 : i32 to index
    %163 = memref.load %arg2[%162] : memref<128xi32, #tpu.memory_space<smem>>
    %164 = arith.index_cast %163 : i32 to index
    %c0_88 = arith.constant 0 : index
    %165 = vector.load %arg4[%164, %c0_88] : memref<256x32xf32, #tpu.memory_space<vmem>>, vector<1x32xf32>
    %c2_89 = arith.constant 2 : index
    %c1_90 = arith.constant 1 : index
    %c0_91 = arith.constant 0 : index
    %166 = vector.load %arg7[%c2_89, %c1_90, %c0_91] : memref<8x8x32xf32, #tpu.memory_space<vmem>>, vector<1x1x32xf32>
    %167 = vector.shape_cast %166 : vector<1x1x32xf32> to vector<1x32xf32>
    %168 = vector.shape_cast %165 : vector<1x32xf32> to vector<1x1x32xf32>
    tpu.vector_store %arg7[%c2_89, %c1_90, %c0_91], %168 {strides = array<i32>} : memref<8x8x32xf32, #tpu.memory_space<vmem>>, vector<1x1x32xf32>,
    %c2_i32_92 = arith.constant 2 : i32
    %169 = arith.addi %152, %c2_i32_92 : i32
    %170 = arith.index_cast %169 : i32 to index
    %171 = memref.load %arg2[%170] : memref<128xi32, #tpu.memory_space<smem>>
    %172 = arith.index_cast %171 : i32 to index
    %c0_93 = arith.constant 0 : index
    %173 = vector.load %arg4[%172, %c0_93] : memref<256x32xf32, #tpu.memory_space<vmem>>, vector<1x32xf32>
    %c2_94 = arith.constant 2 : index
    %c2_95 = arith.constant 2 : index
    %c0_96 = arith.constant 0 : index
    %174 = vector.load %arg7[%c2_94, %c2_95, %c0_96] : memref<8x8x32xf32, #tpu.memory_space<vmem>>, vector<1x1x32xf32>
    %175 = vector.shape_cast %174 : vector<1x1x32xf32> to vector<1x32xf32>
    %176 = vector.shape_cast %173 : vector<1x32xf32> to vector<1x1x32xf32>
    tpu.vector_store %arg7[%c2_94, %c2_95, %c0_96], %176 {strides = array<i32>} : memref<8x8x32xf32, #tpu.memory_space<vmem>>, vector<1x1x32xf32>,
    %c3_i32_97 = arith.constant 3 : i32
    %177 = arith.addi %152, %c3_i32_97 : i32
    %178 = arith.index_cast %177 : i32 to index
    %179 = memref.load %arg2[%178] : memref<128xi32, #tpu.memory_space<smem>>
    %180 = arith.index_cast %179 : i32 to index
    %c0_98 = arith.constant 0 : index
    %181 = vector.load %arg4[%180, %c0_98] : memref<256x32xf32, #tpu.memory_space<vmem>>, vector<1x32xf32>
    %c2_99 = arith.constant 2 : index
    %c3_100 = arith.constant 3 : index
    %c0_101 = arith.constant 0 : index
    %182 = vector.load %arg7[%c2_99, %c3_100, %c0_101] : memref<8x8x32xf32, #tpu.memory_space<vmem>>, vector<1x1x32xf32>
    %183 = vector.shape_cast %182 : vector<1x1x32xf32> to vector<1x32xf32>
    %184 = vector.shape_cast %181 : vector<1x32xf32> to vector<1x1x32xf32>
    tpu.vector_store %arg7[%c2_99, %c3_100, %c0_101], %184 {strides = array<i32>} : memref<8x8x32xf32, #tpu.memory_space<vmem>>, vector<1x1x32xf32>,
    %c4_i32_102 = arith.constant 4 : i32
    %185 = arith.addi %152, %c4_i32_102 : i32
    %186 = arith.index_cast %185 : i32 to index
    %187 = memref.load %arg2[%186] : memref<128xi32, #tpu.memory_space<smem>>
    %188 = arith.index_cast %187 : i32 to index
    %c0_103 = arith.constant 0 : index
    %189 = vector.load %arg4[%188, %c0_103] : memref<256x32xf32, #tpu.memory_space<vmem>>, vector<1x32xf32>
    %c2_104 = arith.constant 2 : index
    %c4_105 = arith.constant 4 : index
    %c0_106 = arith.constant 0 : index
    %190 = vector.load %arg7[%c2_104, %c4_105, %c0_106] : memref<8x8x32xf32, #tpu.memory_space<vmem>>, vector<1x1x32xf32>
    %191 = vector.shape_cast %190 : vector<1x1x32xf32> to vector<1x32xf32>
    %192 = vector.shape_cast %189 : vector<1x32xf32> to vector<1x1x32xf32>
    tpu.vector_store %arg7[%c2_104, %c4_105, %c0_106], %192 {strides = array<i32>} : memref<8x8x32xf32, #tpu.memory_space<vmem>>, vector<1x1x32xf32>,
    %c5_i32_107 = arith.constant 5 : i32
    %193 = arith.addi %152, %c5_i32_107 : i32
    %194 = arith.index_cast %193 : i32 to index
    %195 = memref.load %arg2[%194] : memref<128xi32, #tpu.memory_space<smem>>
    %196 = arith.index_cast %195 : i32 to index
    %c0_108 = arith.constant 0 : index
    %197 = vector.load %arg4[%196, %c0_108] : memref<256x32xf32, #tpu.memory_space<vmem>>, vector<1x32xf32>
    %c2_109 = arith.constant 2 : index
    %c5_110 = arith.constant 5 : index
    %c0_111 = arith.constant 0 : index
    %198 = vector.load %arg7[%c2_109, %c5_110, %c0_111] : memref<8x8x32xf32, #tpu.memory_space<vmem>>, vector<1x1x32xf32>
    %199 = vector.shape_cast %198 : vector<1x1x32xf32> to vector<1x32xf32>
    %200 = vector.shape_cast %197 : vector<1x32xf32> to vector<1x1x32xf32>
    tpu.vector_store %arg7[%c2_109, %c5_110, %c0_111], %200 {strides = array<i32>} : memref<8x8x32xf32, #tpu.memory_space<vmem>>, vector<1x1x32xf32>,
    %c6_i32_112 = arith.constant 6 : i32
    %201 = arith.addi %152, %c6_i32_112 : i32
    %202 = arith.index_cast %201 : i32 to index
    %203 = memref.load %arg2[%202] : memref<128xi32, #tpu.memory_space<smem>>
    %204 = arith.index_cast %203 : i32 to index
    %c0_113 = arith.constant 0 : index
    %205 = vector.load %arg4[%204, %c0_113] : memref<256x32xf32, #tpu.memory_space<vmem>>, vector<1x32xf32>
    %c2_114 = arith.constant 2 : index
    %c6_115 = arith.constant 6 : index
    %c0_116 = arith.constant 0 : index
    %206 = vector.load %arg7[%c2_114, %c6_115, %c0_116] : memref<8x8x32xf32, #tpu.memory_space<vmem>>, vector<1x1x32xf32>
    %207 = vector.shape_cast %206 : vector<1x1x32xf32> to vector<1x32xf32>
    %208 = vector.shape_cast %205 : vector<1x32xf32> to vector<1x1x32xf32>
    tpu.vector_store %arg7[%c2_114, %c6_115, %c0_116], %208 {strides = array<i32>} : memref<8x8x32xf32, #tpu.memory_space<vmem>>, vector<1x1x32xf32>,
    %c7_i32_117 = arith.constant 7 : i32
    %209 = arith.addi %152, %c7_i32_117 : i32
    %210 = arith.index_cast %209 : i32 to index
    %211 = memref.load %arg2[%210] : memref<128xi32, #tpu.memory_space<smem>>
    %212 = arith.index_cast %211 : i32 to index
    %c0_118 = arith.constant 0 : index
    %213 = vector.load %arg4[%212, %c0_118] : memref<256x32xf32, #tpu.memory_space<vmem>>, vector<1x32xf32>
    %c2_119 = arith.constant 2 : index
    %c7_120 = arith.constant 7 : index
    %c0_121 = arith.constant 0 : index
    %214 = vector.load %arg7[%c2_119, %c7_120, %c0_121] : memref<8x8x32xf32, #tpu.memory_space<vmem>>, vector<1x1x32xf32>
    %215 = vector.shape_cast %214 : vector<1x1x32xf32> to vector<1x32xf32>
    %216 = vector.shape_cast %213 : vector<1x32xf32> to vector<1x1x32xf32>
    tpu.vector_store %arg7[%c2_119, %c7_120, %c0_121], %216 {strides = array<i32>} : memref<8x8x32xf32, #tpu.memory_space<vmem>>, vector<1x1x32xf32>,
    %c3_i32_122 = arith.constant 3 : i32
    %217 = arith.addi %0, %c3_i32_122 : i32
    %218 = arith.index_cast %217 : i32 to index
    %219 = memref.load %arg1[%218] : memref<16xi32, #tpu.memory_space<smem>>
    %220 = arith.index_cast %219 : i32 to index
    %c0_123 = arith.constant 0 : index
    %221 = vector.load %arg3[%220, %c0_123] : memref<64x32xf32, #tpu.memory_space<vmem>>, vector<1x32xf32>
    %c3_124 = arith.constant 3 : index
    %c0_125 = arith.constant 0 : index
    %222 = vector.load %arg6[%c3_124, %c0_125] : memref<8x32xf32, #tpu.memory_space<vmem>>, vector<1x32xf32>
    tpu.vector_store %arg6[%c3_124, %c0_125], %221 {strides = array<i32>} : memref<8x32xf32, #tpu.memory_space<vmem>>, vector<1x32xf32>,
    %c3_i32_126 = arith.constant 3 : i32
    %223 = arith.addi %0, %c3_i32_126 : i32
    %c8_i32_127 = arith.constant 8 : i32
    %224 = arith.muli %223, %c8_i32_127 : i32
    %c0_i32_128 = arith.constant 0 : i32
    %225 = arith.addi %224, %c0_i32_128 : i32
    %226 = arith.index_cast %225 : i32 to index
    %227 = memref.load %arg2[%226] : memref<128xi32, #tpu.memory_space<smem>>
    %228 = arith.index_cast %227 : i32 to index
    %c0_129 = arith.constant 0 : index
    %229 = vector.load %arg4[%228, %c0_129] : memref<256x32xf32, #tpu.memory_space<vmem>>, vector<1x32xf32>
    %c3_130 = arith.constant 3 : index
    %c0_131 = arith.constant 0 : index
    %c0_132 = arith.constant 0 : index
    %230 = vector.load %arg7[%c3_130, %c0_131, %c0_132] : memref<8x8x32xf32, #tpu.memory_space<vmem>>, vector<1x1x32xf32>
    %231 = vector.shape_cast %230 : vector<1x1x32xf32> to vector<1x32xf32>
    %232 = vector.shape_cast %229 : vector<1x32xf32> to vector<1x1x32xf32>
    tpu.vector_store %arg7[%c3_130, %c0_131, %c0_132], %232 {strides = array<i32>} : memref<8x8x32xf32, #tpu.memory_space<vmem>>, vector<1x1x32xf32>,
    %c1_i32_133 = arith.constant 1 : i32
    %233 = arith.addi %224, %c1_i32_133 : i32
    %234 = arith.index_cast %233 : i32 to index
    %235 = memref.load %arg2[%234] : memref<128xi32, #tpu.memory_space<smem>>
    %236 = arith.index_cast %235 : i32 to index
    %c0_134 = arith.constant 0 : index
    %237 = vector.load %arg4[%236, %c0_134] : memref<256x32xf32, #tpu.memory_space<vmem>>, vector<1x32xf32>
    %c3_135 = arith.constant 3 : index
    %c1_136 = arith.constant 1 : index
    %c0_137 = arith.constant 0 : index
    %238 = vector.load %arg7[%c3_135, %c1_136, %c0_137] : memref<8x8x32xf32, #tpu.memory_space<vmem>>, vector<1x1x32xf32>
    %239 = vector.shape_cast %238 : vector<1x1x32xf32> to vector<1x32xf32>
    %240 = vector.shape_cast %237 : vector<1x32xf32> to vector<1x1x32xf32>
    tpu.vector_store %arg7[%c3_135, %c1_136, %c0_137], %240 {strides = array<i32>} : memref<8x8x32xf32, #tpu.memory_space<vmem>>, vector<1x1x32xf32>,
    %c2_i32_138 = arith.constant 2 : i32
    %241 = arith.addi %224, %c2_i32_138 : i32
    %242 = arith.index_cast %241 : i32 to index
    %243 = memref.load %arg2[%242] : memref<128xi32, #tpu.memory_space<smem>>
    %244 = arith.index_cast %243 : i32 to index
    %c0_139 = arith.constant 0 : index
    %245 = vector.load %arg4[%244, %c0_139] : memref<256x32xf32, #tpu.memory_space<vmem>>, vector<1x32xf32>
    %c3_140 = arith.constant 3 : index
    %c2_141 = arith.constant 2 : index
    %c0_142 = arith.constant 0 : index
    %246 = vector.load %arg7[%c3_140, %c2_141, %c0_142] : memref<8x8x32xf32, #tpu.memory_space<vmem>>, vector<1x1x32xf32>
    %247 = vector.shape_cast %246 : vector<1x1x32xf32> to vector<1x32xf32>
    %248 = vector.shape_cast %245 : vector<1x32xf32> to vector<1x1x32xf32>
    tpu.vector_store %arg7[%c3_140, %c2_141, %c0_142], %248 {strides = array<i32>} : memref<8x8x32xf32, #tpu.memory_space<vmem>>, vector<1x1x32xf32>,
    %c3_i32_143 = arith.constant 3 : i32
    %249 = arith.addi %224, %c3_i32_143 : i32
    %250 = arith.index_cast %249 : i32 to index
    %251 = memref.load %arg2[%250] : memref<128xi32, #tpu.memory_space<smem>>
    %252 = arith.index_cast %251 : i32 to index
    %c0_144 = arith.constant 0 : index
    %253 = vector.load %arg4[%252, %c0_144] : memref<256x32xf32, #tpu.memory_space<vmem>>, vector<1x32xf32>
    %c3_145 = arith.constant 3 : index
    %c3_146 = arith.constant 3 : index
    %c0_147 = arith.constant 0 : index
    %254 = vector.load %arg7[%c3_145, %c3_146, %c0_147] : memref<8x8x32xf32, #tpu.memory_space<vmem>>, vector<1x1x32xf32>
    %255 = vector.shape_cast %254 : vector<1x1x32xf32> to vector<1x32xf32>
    %256 = vector.shape_cast %253 : vector<1x32xf32> to vector<1x1x32xf32>
    tpu.vector_store %arg7[%c3_145, %c3_146, %c0_147], %256 {strides = array<i32>} : memref<8x8x32xf32, #tpu.memory_space<vmem>>, vector<1x1x32xf32>,
    %c4_i32_148 = arith.constant 4 : i32
    %257 = arith.addi %224, %c4_i32_148 : i32
    %258 = arith.index_cast %257 : i32 to index
    %259 = memref.load %arg2[%258] : memref<128xi32, #tpu.memory_space<smem>>
    %260 = arith.index_cast %259 : i32 to index
    %c0_149 = arith.constant 0 : index
    %261 = vector.load %arg4[%260, %c0_149] : memref<256x32xf32, #tpu.memory_space<vmem>>, vector<1x32xf32>
    %c3_150 = arith.constant 3 : index
    %c4_151 = arith.constant 4 : index
    %c0_152 = arith.constant 0 : index
    %262 = vector.load %arg7[%c3_150, %c4_151, %c0_152] : memref<8x8x32xf32, #tpu.memory_space<vmem>>, vector<1x1x32xf32>
    %263 = vector.shape_cast %262 : vector<1x1x32xf32> to vector<1x32xf32>
    %264 = vector.shape_cast %261 : vector<1x32xf32> to vector<1x1x32xf32>
    tpu.vector_store %arg7[%c3_150, %c4_151, %c0_152], %264 {strides = array<i32>} : memref<8x8x32xf32, #tpu.memory_space<vmem>>, vector<1x1x32xf32>,
    %c5_i32_153 = arith.constant 5 : i32
    %265 = arith.addi %224, %c5_i32_153 : i32
    %266 = arith.index_cast %265 : i32 to index
    %267 = memref.load %arg2[%266] : memref<128xi32, #tpu.memory_space<smem>>
    %268 = arith.index_cast %267 : i32 to index
    %c0_154 = arith.constant 0 : index
    %269 = vector.load %arg4[%268, %c0_154] : memref<256x32xf32, #tpu.memory_space<vmem>>, vector<1x32xf32>
    %c3_155 = arith.constant 3 : index
    %c5_156 = arith.constant 5 : index
    %c0_157 = arith.constant 0 : index
    %270 = vector.load %arg7[%c3_155, %c5_156, %c0_157] : memref<8x8x32xf32, #tpu.memory_space<vmem>>, vector<1x1x32xf32>
    %271 = vector.shape_cast %270 : vector<1x1x32xf32> to vector<1x32xf32>
    %272 = vector.shape_cast %269 : vector<1x32xf32> to vector<1x1x32xf32>
    tpu.vector_store %arg7[%c3_155, %c5_156, %c0_157], %272 {strides = array<i32>} : memref<8x8x32xf32, #tpu.memory_space<vmem>>, vector<1x1x32xf32>,
    %c6_i32_158 = arith.constant 6 : i32
    %273 = arith.addi %224, %c6_i32_158 : i32
    %274 = arith.index_cast %273 : i32 to index
    %275 = memref.load %arg2[%274] : memref<128xi32, #tpu.memory_space<smem>>
    %276 = arith.index_cast %275 : i32 to index
    %c0_159 = arith.constant 0 : index
    %277 = vector.load %arg4[%276, %c0_159] : memref<256x32xf32, #tpu.memory_space<vmem>>, vector<1x32xf32>
    %c3_160 = arith.constant 3 : index
    %c6_161 = arith.constant 6 : index
    %c0_162 = arith.constant 0 : index
    %278 = vector.load %arg7[%c3_160, %c6_161, %c0_162] : memref<8x8x32xf32, #tpu.memory_space<vmem>>, vector<1x1x32xf32>
    %279 = vector.shape_cast %278 : vector<1x1x32xf32> to vector<1x32xf32>
    %280 = vector.shape_cast %277 : vector<1x32xf32> to vector<1x1x32xf32>
    tpu.vector_store %arg7[%c3_160, %c6_161, %c0_162], %280 {strides = array<i32>} : memref<8x8x32xf32, #tpu.memory_space<vmem>>, vector<1x1x32xf32>,
    %c7_i32_163 = arith.constant 7 : i32
    %281 = arith.addi %224, %c7_i32_163 : i32
    %282 = arith.index_cast %281 : i32 to index
    %283 = memref.load %arg2[%282] : memref<128xi32, #tpu.memory_space<smem>>
    %284 = arith.index_cast %283 : i32 to index
    %c0_164 = arith.constant 0 : index
    %285 = vector.load %arg4[%284, %c0_164] : memref<256x32xf32, #tpu.memory_space<vmem>>, vector<1x32xf32>
    %c3_165 = arith.constant 3 : index
    %c7_166 = arith.constant 7 : index
    %c0_167 = arith.constant 0 : index
    %286 = vector.load %arg7[%c3_165, %c7_166, %c0_167] : memref<8x8x32xf32, #tpu.memory_space<vmem>>, vector<1x1x32xf32>
    %287 = vector.shape_cast %286 : vector<1x1x32xf32> to vector<1x32xf32>
    %288 = vector.shape_cast %285 : vector<1x32xf32> to vector<1x1x32xf32>
    tpu.vector_store %arg7[%c3_165, %c7_166, %c0_167], %288 {strides = array<i32>} : memref<8x8x32xf32, #tpu.memory_space<vmem>>, vector<1x1x32xf32>,
    %c4_i32_168 = arith.constant 4 : i32
    %289 = arith.addi %0, %c4_i32_168 : i32
    %290 = arith.index_cast %289 : i32 to index
    %291 = memref.load %arg1[%290] : memref<16xi32, #tpu.memory_space<smem>>
    %292 = arith.index_cast %291 : i32 to index
    %c0_169 = arith.constant 0 : index
    %293 = vector.load %arg3[%292, %c0_169] : memref<64x32xf32, #tpu.memory_space<vmem>>, vector<1x32xf32>
    %c4_170 = arith.constant 4 : index
    %c0_171 = arith.constant 0 : index
    %294 = vector.load %arg6[%c4_170, %c0_171] : memref<8x32xf32, #tpu.memory_space<vmem>>, vector<1x32xf32>
    tpu.vector_store %arg6[%c4_170, %c0_171], %293 {strides = array<i32>} : memref<8x32xf32, #tpu.memory_space<vmem>>, vector<1x32xf32>,
    %c4_i32_172 = arith.constant 4 : i32
    %295 = arith.addi %0, %c4_i32_172 : i32
    %c8_i32_173 = arith.constant 8 : i32
    %296 = arith.muli %295, %c8_i32_173 : i32
    %c0_i32_174 = arith.constant 0 : i32
    %297 = arith.addi %296, %c0_i32_174 : i32
    %298 = arith.index_cast %297 : i32 to index
    %299 = memref.load %arg2[%298] : memref<128xi32, #tpu.memory_space<smem>>
    %300 = arith.index_cast %299 : i32 to index
    %c0_175 = arith.constant 0 : index
    %301 = vector.load %arg4[%300, %c0_175] : memref<256x32xf32, #tpu.memory_space<vmem>>, vector<1x32xf32>
    %c4_176 = arith.constant 4 : index
    %c0_177 = arith.constant 0 : index
    %c0_178 = arith.constant 0 : index
    %302 = vector.load %arg7[%c4_176, %c0_177, %c0_178] : memref<8x8x32xf32, #tpu.memory_space<vmem>>, vector<1x1x32xf32>
    %303 = vector.shape_cast %302 : vector<1x1x32xf32> to vector<1x32xf32>
    %304 = vector.shape_cast %301 : vector<1x32xf32> to vector<1x1x32xf32>
    tpu.vector_store %arg7[%c4_176, %c0_177, %c0_178], %304 {strides = array<i32>} : memref<8x8x32xf32, #tpu.memory_space<vmem>>, vector<1x1x32xf32>,
    %c1_i32_179 = arith.constant 1 : i32
    %305 = arith.addi %296, %c1_i32_179 : i32
    %306 = arith.index_cast %305 : i32 to index
    %307 = memref.load %arg2[%306] : memref<128xi32, #tpu.memory_space<smem>>
    %308 = arith.index_cast %307 : i32 to index
    %c0_180 = arith.constant 0 : index
    %309 = vector.load %arg4[%308, %c0_180] : memref<256x32xf32, #tpu.memory_space<vmem>>, vector<1x32xf32>
    %c4_181 = arith.constant 4 : index
    %c1_182 = arith.constant 1 : index
    %c0_183 = arith.constant 0 : index
    %310 = vector.load %arg7[%c4_181, %c1_182, %c0_183] : memref<8x8x32xf32, #tpu.memory_space<vmem>>, vector<1x1x32xf32>
    %311 = vector.shape_cast %310 : vector<1x1x32xf32> to vector<1x32xf32>
    %312 = vector.shape_cast %309 : vector<1x32xf32> to vector<1x1x32xf32>
    tpu.vector_store %arg7[%c4_181, %c1_182, %c0_183], %312 {strides = array<i32>} : memref<8x8x32xf32, #tpu.memory_space<vmem>>, vector<1x1x32xf32>,
    %c2_i32_184 = arith.constant 2 : i32
    %313 = arith.addi %296, %c2_i32_184 : i32
    %314 = arith.index_cast %313 : i32 to index
    %315 = memref.load %arg2[%314] : memref<128xi32, #tpu.memory_space<smem>>
    %316 = arith.index_cast %315 : i32 to index
    %c0_185 = arith.constant 0 : index
    %317 = vector.load %arg4[%316, %c0_185] : memref<256x32xf32, #tpu.memory_space<vmem>>, vector<1x32xf32>
    %c4_186 = arith.constant 4 : index
    %c2_187 = arith.constant 2 : index
    %c0_188 = arith.constant 0 : index
    %318 = vector.load %arg7[%c4_186, %c2_187, %c0_188] : memref<8x8x32xf32, #tpu.memory_space<vmem>>, vector<1x1x32xf32>
    %319 = vector.shape_cast %318 : vector<1x1x32xf32> to vector<1x32xf32>
    %320 = vector.shape_cast %317 : vector<1x32xf32> to vector<1x1x32xf32>
    tpu.vector_store %arg7[%c4_186, %c2_187, %c0_188], %320 {strides = array<i32>} : memref<8x8x32xf32, #tpu.memory_space<vmem>>, vector<1x1x32xf32>,
    %c3_i32_189 = arith.constant 3 : i32
    %321 = arith.addi %296, %c3_i32_189 : i32
    %322 = arith.index_cast %321 : i32 to index
    %323 = memref.load %arg2[%322] : memref<128xi32, #tpu.memory_space<smem>>
    %324 = arith.index_cast %323 : i32 to index
    %c0_190 = arith.constant 0 : index
    %325 = vector.load %arg4[%324, %c0_190] : memref<256x32xf32, #tpu.memory_space<vmem>>, vector<1x32xf32>
    %c4_191 = arith.constant 4 : index
    %c3_192 = arith.constant 3 : index
    %c0_193 = arith.constant 0 : index
    %326 = vector.load %arg7[%c4_191, %c3_192, %c0_193] : memref<8x8x32xf32, #tpu.memory_space<vmem>>, vector<1x1x32xf32>
    %327 = vector.shape_cast %326 : vector<1x1x32xf32> to vector<1x32xf32>
    %328 = vector.shape_cast %325 : vector<1x32xf32> to vector<1x1x32xf32>
    tpu.vector_store %arg7[%c4_191, %c3_192, %c0_193], %328 {strides = array<i32>} : memref<8x8x32xf32, #tpu.memory_space<vmem>>, vector<1x1x32xf32>,
    %c4_i32_194 = arith.constant 4 : i32
    %329 = arith.addi %296, %c4_i32_194 : i32
    %330 = arith.index_cast %329 : i32 to index
    %331 = memref.load %arg2[%330] : memref<128xi32, #tpu.memory_space<smem>>
    %332 = arith.index_cast %331 : i32 to index
    %c0_195 = arith.constant 0 : index
    %333 = vector.load %arg4[%332, %c0_195] : memref<256x32xf32, #tpu.memory_space<vmem>>, vector<1x32xf32>
    %c4_196 = arith.constant 4 : index
    %c4_197 = arith.constant 4 : index
    %c0_198 = arith.constant 0 : index
    %334 = vector.load %arg7[%c4_196, %c4_197, %c0_198] : memref<8x8x32xf32, #tpu.memory_space<vmem>>, vector<1x1x32xf32>
    %335 = vector.shape_cast %334 : vector<1x1x32xf32> to vector<1x32xf32>
    %336 = vector.shape_cast %333 : vector<1x32xf32> to vector<1x1x32xf32>
    tpu.vector_store %arg7[%c4_196, %c4_197, %c0_198], %336 {strides = array<i32>} : memref<8x8x32xf32, #tpu.memory_space<vmem>>, vector<1x1x32xf32>,
    %c5_i32_199 = arith.constant 5 : i32
    %337 = arith.addi %296, %c5_i32_199 : i32
    %338 = arith.index_cast %337 : i32 to index
    %339 = memref.load %arg2[%338] : memref<128xi32, #tpu.memory_space<smem>>
    %340 = arith.index_cast %339 : i32 to index
    %c0_200 = arith.constant 0 : index
    %341 = vector.load %arg4[%340, %c0_200] : memref<256x32xf32, #tpu.memory_space<vmem>>, vector<1x32xf32>
    %c4_201 = arith.constant 4 : index
    %c5_202 = arith.constant 5 : index
    %c0_203 = arith.constant 0 : index
    %342 = vector.load %arg7[%c4_201, %c5_202, %c0_203] : memref<8x8x32xf32, #tpu.memory_space<vmem>>, vector<1x1x32xf32>
    %343 = vector.shape_cast %342 : vector<1x1x32xf32> to vector<1x32xf32>
    %344 = vector.shape_cast %341 : vector<1x32xf32> to vector<1x1x32xf32>
    tpu.vector_store %arg7[%c4_201, %c5_202, %c0_203], %344 {strides = array<i32>} : memref<8x8x32xf32, #tpu.memory_space<vmem>>, vector<1x1x32xf32>,
    %c6_i32_204 = arith.constant 6 : i32
    %345 = arith.addi %296, %c6_i32_204 : i32
    %346 = arith.index_cast %345 : i32 to index
    %347 = memref.load %arg2[%346] : memref<128xi32, #tpu.memory_space<smem>>
    %348 = arith.index_cast %347 : i32 to index
    %c0_205 = arith.constant 0 : index
    %349 = vector.load %arg4[%348, %c0_205] : memref<256x32xf32, #tpu.memory_space<vmem>>, vector<1x32xf32>
    %c4_206 = arith.constant 4 : index
    %c6_207 = arith.constant 6 : index
    %c0_208 = arith.constant 0 : index
    %350 = vector.load %arg7[%c4_206, %c6_207, %c0_208] : memref<8x8x32xf32, #tpu.memory_space<vmem>>, vector<1x1x32xf32>
    %351 = vector.shape_cast %350 : vector<1x1x32xf32> to vector<1x32xf32>
    %352 = vector.shape_cast %349 : vector<1x32xf32> to vector<1x1x32xf32>
    tpu.vector_store %arg7[%c4_206, %c6_207, %c0_208], %352 {strides = array<i32>} : memref<8x8x32xf32, #tpu.memory_space<vmem>>, vector<1x1x32xf32>,
    %c7_i32_209 = arith.constant 7 : i32
    %353 = arith.addi %296, %c7_i32_209 : i32
    %354 = arith.index_cast %353 : i32 to index
    %355 = memref.load %arg2[%354] : memref<128xi32, #tpu.memory_space<smem>>
    %356 = arith.index_cast %355 : i32 to index
    %c0_210 = arith.constant 0 : index
    %357 = vector.load %arg4[%356, %c0_210] : memref<256x32xf32, #tpu.memory_space<vmem>>, vector<1x32xf32>
    %c4_211 = arith.constant 4 : index
    %c7_212 = arith.constant 7 : index
    %c0_213 = arith.constant 0 : index
    %358 = vector.load %arg7[%c4_211, %c7_212, %c0_213] : memref<8x8x32xf32, #tpu.memory_space<vmem>>, vector<1x1x32xf32>
    %359 = vector.shape_cast %358 : vector<1x1x32xf32> to vector<1x32xf32>
    %360 = vector.shape_cast %357 : vector<1x32xf32> to vector<1x1x32xf32>
    tpu.vector_store %arg7[%c4_211, %c7_212, %c0_213], %360 {strides = array<i32>} : memref<8x8x32xf32, #tpu.memory_space<vmem>>, vector<1x1x32xf32>,
    %c5_i32_214 = arith.constant 5 : i32
    %361 = arith.addi %0, %c5_i32_214 : i32
    %362 = arith.index_cast %361 : i32 to index
    %363 = memref.load %arg1[%362] : memref<16xi32, #tpu.memory_space<smem>>
    %364 = arith.index_cast %363 : i32 to index
    %c0_215 = arith.constant 0 : index
    %365 = vector.load %arg3[%364, %c0_215] : memref<64x32xf32, #tpu.memory_space<vmem>>, vector<1x32xf32>
    %c5_216 = arith.constant 5 : index
    %c0_217 = arith.constant 0 : index
    %366 = vector.load %arg6[%c5_216, %c0_217] : memref<8x32xf32, #tpu.memory_space<vmem>>, vector<1x32xf32>
    tpu.vector_store %arg6[%c5_216, %c0_217], %365 {strides = array<i32>} : memref<8x32xf32, #tpu.memory_space<vmem>>, vector<1x32xf32>,
    %c5_i32_218 = arith.constant 5 : i32
    %367 = arith.addi %0, %c5_i32_218 : i32
    %c8_i32_219 = arith.constant 8 : i32
    %368 = arith.muli %367, %c8_i32_219 : i32
    %c0_i32_220 = arith.constant 0 : i32
    %369 = arith.addi %368, %c0_i32_220 : i32
    %370 = arith.index_cast %369 : i32 to index
    %371 = memref.load %arg2[%370] : memref<128xi32, #tpu.memory_space<smem>>
    %372 = arith.index_cast %371 : i32 to index
    %c0_221 = arith.constant 0 : index
    %373 = vector.load %arg4[%372, %c0_221] : memref<256x32xf32, #tpu.memory_space<vmem>>, vector<1x32xf32>
    %c5_222 = arith.constant 5 : index
    %c0_223 = arith.constant 0 : index
    %c0_224 = arith.constant 0 : index
    %374 = vector.load %arg7[%c5_222, %c0_223, %c0_224] : memref<8x8x32xf32, #tpu.memory_space<vmem>>, vector<1x1x32xf32>
    %375 = vector.shape_cast %374 : vector<1x1x32xf32> to vector<1x32xf32>
    %376 = vector.shape_cast %373 : vector<1x32xf32> to vector<1x1x32xf32>
    tpu.vector_store %arg7[%c5_222, %c0_223, %c0_224], %376 {strides = array<i32>} : memref<8x8x32xf32, #tpu.memory_space<vmem>>, vector<1x1x32xf32>,
    %c1_i32_225 = arith.constant 1 : i32
    %377 = arith.addi %368, %c1_i32_225 : i32
    %378 = arith.index_cast %377 : i32 to index
    %379 = memref.load %arg2[%378] : memref<128xi32, #tpu.memory_space<smem>>
    %380 = arith.index_cast %379 : i32 to index
    %c0_226 = arith.constant 0 : index
    %381 = vector.load %arg4[%380, %c0_226] : memref<256x32xf32, #tpu.memory_space<vmem>>, vector<1x32xf32>
    %c5_227 = arith.constant 5 : index
    %c1_228 = arith.constant 1 : index
    %c0_229 = arith.constant 0 : index
    %382 = vector.load %arg7[%c5_227, %c1_228, %c0_229] : memref<8x8x32xf32, #tpu.memory_space<vmem>>, vector<1x1x32xf32>
    %383 = vector.shape_cast %382 : vector<1x1x32xf32> to vector<1x32xf32>
    %384 = vector.shape_cast %381 : vector<1x32xf32> to vector<1x1x32xf32>
    tpu.vector_store %arg7[%c5_227, %c1_228, %c0_229], %384 {strides = array<i32>} : memref<8x8x32xf32, #tpu.memory_space<vmem>>, vector<1x1x32xf32>,
    %c2_i32_230 = arith.constant 2 : i32
    %385 = arith.addi %368, %c2_i32_230 : i32
    %386 = arith.index_cast %385 : i32 to index
    %387 = memref.load %arg2[%386] : memref<128xi32, #tpu.memory_space<smem>>
    %388 = arith.index_cast %387 : i32 to index
    %c0_231 = arith.constant 0 : index
    %389 = vector.load %arg4[%388, %c0_231] : memref<256x32xf32, #tpu.memory_space<vmem>>, vector<1x32xf32>
    %c5_232 = arith.constant 5 : index
    %c2_233 = arith.constant 2 : index
    %c0_234 = arith.constant 0 : index
    %390 = vector.load %arg7[%c5_232, %c2_233, %c0_234] : memref<8x8x32xf32, #tpu.memory_space<vmem>>, vector<1x1x32xf32>
    %391 = vector.shape_cast %390 : vector<1x1x32xf32> to vector<1x32xf32>
    %392 = vector.shape_cast %389 : vector<1x32xf32> to vector<1x1x32xf32>
    tpu.vector_store %arg7[%c5_232, %c2_233, %c0_234], %392 {strides = array<i32>} : memref<8x8x32xf32, #tpu.memory_space<vmem>>, vector<1x1x32xf32>,
    %c3_i32_235 = arith.constant 3 : i32
    %393 = arith.addi %368, %c3_i32_235 : i32
    %394 = arith.index_cast %393 : i32 to index
    %395 = memref.load %arg2[%394] : memref<128xi32, #tpu.memory_space<smem>>
    %396 = arith.index_cast %395 : i32 to index
    %c0_236 = arith.constant 0 : index
    %397 = vector.load %arg4[%396, %c0_236] : memref<256x32xf32, #tpu.memory_space<vmem>>, vector<1x32xf32>
    %c5_237 = arith.constant 5 : index
    %c3_238 = arith.constant 3 : index
    %c0_239 = arith.constant 0 : index
    %398 = vector.load %arg7[%c5_237, %c3_238, %c0_239] : memref<8x8x32xf32, #tpu.memory_space<vmem>>, vector<1x1x32xf32>
    %399 = vector.shape_cast %398 : vector<1x1x32xf32> to vector<1x32xf32>
    %400 = vector.shape_cast %397 : vector<1x32xf32> to vector<1x1x32xf32>
    tpu.vector_store %arg7[%c5_237, %c3_238, %c0_239], %400 {strides = array<i32>} : memref<8x8x32xf32, #tpu.memory_space<vmem>>, vector<1x1x32xf32>,
    %c4_i32_240 = arith.constant 4 : i32
    %401 = arith.addi %368, %c4_i32_240 : i32
    %402 = arith.index_cast %401 : i32 to index
    %403 = memref.load %arg2[%402] : memref<128xi32, #tpu.memory_space<smem>>
    %404 = arith.index_cast %403 : i32 to index
    %c0_241 = arith.constant 0 : index
    %405 = vector.load %arg4[%404, %c0_241] : memref<256x32xf32, #tpu.memory_space<vmem>>, vector<1x32xf32>
    %c5_242 = arith.constant 5 : index
    %c4_243 = arith.constant 4 : index
    %c0_244 = arith.constant 0 : index
    %406 = vector.load %arg7[%c5_242, %c4_243, %c0_244] : memref<8x8x32xf32, #tpu.memory_space<vmem>>, vector<1x1x32xf32>
    %407 = vector.shape_cast %406 : vector<1x1x32xf32> to vector<1x32xf32>
    %408 = vector.shape_cast %405 : vector<1x32xf32> to vector<1x1x32xf32>
    tpu.vector_store %arg7[%c5_242, %c4_243, %c0_244], %408 {strides = array<i32>} : memref<8x8x32xf32, #tpu.memory_space<vmem>>, vector<1x1x32xf32>,
    %c5_i32_245 = arith.constant 5 : i32
    %409 = arith.addi %368, %c5_i32_245 : i32
    %410 = arith.index_cast %409 : i32 to index
    %411 = memref.load %arg2[%410] : memref<128xi32, #tpu.memory_space<smem>>
    %412 = arith.index_cast %411 : i32 to index
    %c0_246 = arith.constant 0 : index
    %413 = vector.load %arg4[%412, %c0_246] : memref<256x32xf32, #tpu.memory_space<vmem>>, vector<1x32xf32>
    %c5_247 = arith.constant 5 : index
    %c5_248 = arith.constant 5 : index
    %c0_249 = arith.constant 0 : index
    %414 = vector.load %arg7[%c5_247, %c5_248, %c0_249] : memref<8x8x32xf32, #tpu.memory_space<vmem>>, vector<1x1x32xf32>
    %415 = vector.shape_cast %414 : vector<1x1x32xf32> to vector<1x32xf32>
    %416 = vector.shape_cast %413 : vector<1x32xf32> to vector<1x1x32xf32>
    tpu.vector_store %arg7[%c5_247, %c5_248, %c0_249], %416 {strides = array<i32>} : memref<8x8x32xf32, #tpu.memory_space<vmem>>, vector<1x1x32xf32>,
    %c6_i32_250 = arith.constant 6 : i32
    %417 = arith.addi %368, %c6_i32_250 : i32
    %418 = arith.index_cast %417 : i32 to index
    %419 = memref.load %arg2[%418] : memref<128xi32, #tpu.memory_space<smem>>
    %420 = arith.index_cast %419 : i32 to index
    %c0_251 = arith.constant 0 : index
    %421 = vector.load %arg4[%420, %c0_251] : memref<256x32xf32, #tpu.memory_space<vmem>>, vector<1x32xf32>
    %c5_252 = arith.constant 5 : index
    %c6_253 = arith.constant 6 : index
    %c0_254 = arith.constant 0 : index
    %422 = vector.load %arg7[%c5_252, %c6_253, %c0_254] : memref<8x8x32xf32, #tpu.memory_space<vmem>>, vector<1x1x32xf32>
    %423 = vector.shape_cast %422 : vector<1x1x32xf32> to vector<1x32xf32>
    %424 = vector.shape_cast %421 : vector<1x32xf32> to vector<1x1x32xf32>
    tpu.vector_store %arg7[%c5_252, %c6_253, %c0_254], %424 {strides = array<i32>} : memref<8x8x32xf32, #tpu.memory_space<vmem>>, vector<1x1x32xf32>,
    %c7_i32_255 = arith.constant 7 : i32
    %425 = arith.addi %368, %c7_i32_255 : i32
    %426 = arith.index_cast %425 : i32 to index
    %427 = memref.load %arg2[%426] : memref<128xi32, #tpu.memory_space<smem>>
    %428 = arith.index_cast %427 : i32 to index
    %c0_256 = arith.constant 0 : index
    %429 = vector.load %arg4[%428, %c0_256] : memref<256x32xf32, #tpu.memory_space<vmem>>, vector<1x32xf32>
    %c5_257 = arith.constant 5 : index
    %c7_258 = arith.constant 7 : index
    %c0_259 = arith.constant 0 : index
    %430 = vector.load %arg7[%c5_257, %c7_258, %c0_259] : memref<8x8x32xf32, #tpu.memory_space<vmem>>, vector<1x1x32xf32>
    %431 = vector.shape_cast %430 : vector<1x1x32xf32> to vector<1x32xf32>
    %432 = vector.shape_cast %429 : vector<1x32xf32> to vector<1x1x32xf32>
    tpu.vector_store %arg7[%c5_257, %c7_258, %c0_259], %432 {strides = array<i32>} : memref<8x8x32xf32, #tpu.memory_space<vmem>>, vector<1x1x32xf32>,
    %c6_i32_260 = arith.constant 6 : i32
    %433 = arith.addi %0, %c6_i32_260 : i32
    %434 = arith.index_cast %433 : i32 to index
    %435 = memref.load %arg1[%434] : memref<16xi32, #tpu.memory_space<smem>>
    %436 = arith.index_cast %435 : i32 to index
    %c0_261 = arith.constant 0 : index
    %437 = vector.load %arg3[%436, %c0_261] : memref<64x32xf32, #tpu.memory_space<vmem>>, vector<1x32xf32>
    %c6_262 = arith.constant 6 : index
    %c0_263 = arith.constant 0 : index
    %438 = vector.load %arg6[%c6_262, %c0_263] : memref<8x32xf32, #tpu.memory_space<vmem>>, vector<1x32xf32>
    tpu.vector_store %arg6[%c6_262, %c0_263], %437 {strides = array<i32>} : memref<8x32xf32, #tpu.memory_space<vmem>>, vector<1x32xf32>,
    %c6_i32_264 = arith.constant 6 : i32
    %439 = arith.addi %0, %c6_i32_264 : i32
    %c8_i32_265 = arith.constant 8 : i32
    %440 = arith.muli %439, %c8_i32_265 : i32
    %c0_i32_266 = arith.constant 0 : i32
    %441 = arith.addi %440, %c0_i32_266 : i32
    %442 = arith.index_cast %441 : i32 to index
    %443 = memref.load %arg2[%442] : memref<128xi32, #tpu.memory_space<smem>>
    %444 = arith.index_cast %443 : i32 to index
    %c0_267 = arith.constant 0 : index
    %445 = vector.load %arg4[%444, %c0_267] : memref<256x32xf32, #tpu.memory_space<vmem>>, vector<1x32xf32>
    %c6_268 = arith.constant 6 : index
    %c0_269 = arith.constant 0 : index
    %c0_270 = arith.constant 0 : index
    %446 = vector.load %arg7[%c6_268, %c0_269, %c0_270] : memref<8x8x32xf32, #tpu.memory_space<vmem>>, vector<1x1x32xf32>
    %447 = vector.shape_cast %446 : vector<1x1x32xf32> to vector<1x32xf32>
    %448 = vector.shape_cast %445 : vector<1x32xf32> to vector<1x1x32xf32>
    tpu.vector_store %arg7[%c6_268, %c0_269, %c0_270], %448 {strides = array<i32>} : memref<8x8x32xf32, #tpu.memory_space<vmem>>, vector<1x1x32xf32>,
    %c1_i32_271 = arith.constant 1 : i32
    %449 = arith.addi %440, %c1_i32_271 : i32
    %450 = arith.index_cast %449 : i32 to index
    %451 = memref.load %arg2[%450] : memref<128xi32, #tpu.memory_space<smem>>
    %452 = arith.index_cast %451 : i32 to index
    %c0_272 = arith.constant 0 : index
    %453 = vector.load %arg4[%452, %c0_272] : memref<256x32xf32, #tpu.memory_space<vmem>>, vector<1x32xf32>
    %c6_273 = arith.constant 6 : index
    %c1_274 = arith.constant 1 : index
    %c0_275 = arith.constant 0 : index
    %454 = vector.load %arg7[%c6_273, %c1_274, %c0_275] : memref<8x8x32xf32, #tpu.memory_space<vmem>>, vector<1x1x32xf32>
    %455 = vector.shape_cast %454 : vector<1x1x32xf32> to vector<1x32xf32>
    %456 = vector.shape_cast %453 : vector<1x32xf32> to vector<1x1x32xf32>
    tpu.vector_store %arg7[%c6_273, %c1_274, %c0_275], %456 {strides = array<i32>} : memref<8x8x32xf32, #tpu.memory_space<vmem>>, vector<1x1x32xf32>,
    %c2_i32_276 = arith.constant 2 : i32
    %457 = arith.addi %440, %c2_i32_276 : i32
    %458 = arith.index_cast %457 : i32 to index
    %459 = memref.load %arg2[%458] : memref<128xi32, #tpu.memory_space<smem>>
    %460 = arith.index_cast %459 : i32 to index
    %c0_277 = arith.constant 0 : index
    %461 = vector.load %arg4[%460, %c0_277] : memref<256x32xf32, #tpu.memory_space<vmem>>, vector<1x32xf32>
    %c6_278 = arith.constant 6 : index
    %c2_279 = arith.constant 2 : index
    %c0_280 = arith.constant 0 : index
    %462 = vector.load %arg7[%c6_278, %c2_279, %c0_280] : memref<8x8x32xf32, #tpu.memory_space<vmem>>, vector<1x1x32xf32>
    %463 = vector.shape_cast %462 : vector<1x1x32xf32> to vector<1x32xf32>
    %464 = vector.shape_cast %461 : vector<1x32xf32> to vector<1x1x32xf32>
    tpu.vector_store %arg7[%c6_278, %c2_279, %c0_280], %464 {strides = array<i32>} : memref<8x8x32xf32, #tpu.memory_space<vmem>>, vector<1x1x32xf32>,
    %c3_i32_281 = arith.constant 3 : i32
    %465 = arith.addi %440, %c3_i32_281 : i32
    %466 = arith.index_cast %465 : i32 to index
    %467 = memref.load %arg2[%466] : memref<128xi32, #tpu.memory_space<smem>>
    %468 = arith.index_cast %467 : i32 to index
    %c0_282 = arith.constant 0 : index
    %469 = vector.load %arg4[%468, %c0_282] : memref<256x32xf32, #tpu.memory_space<vmem>>, vector<1x32xf32>
    %c6_283 = arith.constant 6 : index
    %c3_284 = arith.constant 3 : index
    %c0_285 = arith.constant 0 : index
    %470 = vector.load %arg7[%c6_283, %c3_284, %c0_285] : memref<8x8x32xf32, #tpu.memory_space<vmem>>, vector<1x1x32xf32>
    %471 = vector.shape_cast %470 : vector<1x1x32xf32> to vector<1x32xf32>
    %472 = vector.shape_cast %469 : vector<1x32xf32> to vector<1x1x32xf32>
    tpu.vector_store %arg7[%c6_283, %c3_284, %c0_285], %472 {strides = array<i32>} : memref<8x8x32xf32, #tpu.memory_space<vmem>>, vector<1x1x32xf32>,
    %c4_i32_286 = arith.constant 4 : i32
    %473 = arith.addi %440, %c4_i32_286 : i32
    %474 = arith.index_cast %473 : i32 to index
    %475 = memref.load %arg2[%474] : memref<128xi32, #tpu.memory_space<smem>>
    %476 = arith.index_cast %475 : i32 to index
    %c0_287 = arith.constant 0 : index
    %477 = vector.load %arg4[%476, %c0_287] : memref<256x32xf32, #tpu.memory_space<vmem>>, vector<1x32xf32>
    %c6_288 = arith.constant 6 : index
    %c4_289 = arith.constant 4 : index
    %c0_290 = arith.constant 0 : index
    %478 = vector.load %arg7[%c6_288, %c4_289, %c0_290] : memref<8x8x32xf32, #tpu.memory_space<vmem>>, vector<1x1x32xf32>
    %479 = vector.shape_cast %478 : vector<1x1x32xf32> to vector<1x32xf32>
    %480 = vector.shape_cast %477 : vector<1x32xf32> to vector<1x1x32xf32>
    tpu.vector_store %arg7[%c6_288, %c4_289, %c0_290], %480 {strides = array<i32>} : memref<8x8x32xf32, #tpu.memory_space<vmem>>, vector<1x1x32xf32>,
    %c5_i32_291 = arith.constant 5 : i32
    %481 = arith.addi %440, %c5_i32_291 : i32
    %482 = arith.index_cast %481 : i32 to index
    %483 = memref.load %arg2[%482] : memref<128xi32, #tpu.memory_space<smem>>
    %484 = arith.index_cast %483 : i32 to index
    %c0_292 = arith.constant 0 : index
    %485 = vector.load %arg4[%484, %c0_292] : memref<256x32xf32, #tpu.memory_space<vmem>>, vector<1x32xf32>
    %c6_293 = arith.constant 6 : index
    %c5_294 = arith.constant 5 : index
    %c0_295 = arith.constant 0 : index
    %486 = vector.load %arg7[%c6_293, %c5_294, %c0_295] : memref<8x8x32xf32, #tpu.memory_space<vmem>>, vector<1x1x32xf32>
    %487 = vector.shape_cast %486 : vector<1x1x32xf32> to vector<1x32xf32>
    %488 = vector.shape_cast %485 : vector<1x32xf32> to vector<1x1x32xf32>
    tpu.vector_store %arg7[%c6_293, %c5_294, %c0_295], %488 {strides = array<i32>} : memref<8x8x32xf32, #tpu.memory_space<vmem>>, vector<1x1x32xf32>,
    %c6_i32_296 = arith.constant 6 : i32
    %489 = arith.addi %440, %c6_i32_296 : i32
    %490 = arith.index_cast %489 : i32 to index
    %491 = memref.load %arg2[%490] : memref<128xi32, #tpu.memory_space<smem>>
    %492 = arith.index_cast %491 : i32 to index
    %c0_297 = arith.constant 0 : index
    %493 = vector.load %arg4[%492, %c0_297] : memref<256x32xf32, #tpu.memory_space<vmem>>, vector<1x32xf32>
    %c6_298 = arith.constant 6 : index
    %c6_299 = arith.constant 6 : index
    %c0_300 = arith.constant 0 : index
    %494 = vector.load %arg7[%c6_298, %c6_299, %c0_300] : memref<8x8x32xf32, #tpu.memory_space<vmem>>, vector<1x1x32xf32>
    %495 = vector.shape_cast %494 : vector<1x1x32xf32> to vector<1x32xf32>
    %496 = vector.shape_cast %493 : vector<1x32xf32> to vector<1x1x32xf32>
    tpu.vector_store %arg7[%c6_298, %c6_299, %c0_300], %496 {strides = array<i32>} : memref<8x8x32xf32, #tpu.memory_space<vmem>>, vector<1x1x32xf32>,
    %c7_i32_301 = arith.constant 7 : i32
    %497 = arith.addi %440, %c7_i32_301 : i32
    %498 = arith.index_cast %497 : i32 to index
    %499 = memref.load %arg2[%498] : memref<128xi32, #tpu.memory_space<smem>>
    %500 = arith.index_cast %499 : i32 to index
    %c0_302 = arith.constant 0 : index
    %501 = vector.load %arg4[%500, %c0_302] : memref<256x32xf32, #tpu.memory_space<vmem>>, vector<1x32xf32>
    %c6_303 = arith.constant 6 : index
    %c7_304 = arith.constant 7 : index
    %c0_305 = arith.constant 0 : index
    %502 = vector.load %arg7[%c6_303, %c7_304, %c0_305] : memref<8x8x32xf32, #tpu.memory_space<vmem>>, vector<1x1x32xf32>
    %503 = vector.shape_cast %502 : vector<1x1x32xf32> to vector<1x32xf32>
    %504 = vector.shape_cast %501 : vector<1x32xf32> to vector<1x1x32xf32>
    tpu.vector_store %arg7[%c6_303, %c7_304, %c0_305], %504 {strides = array<i32>} : memref<8x8x32xf32, #tpu.memory_space<vmem>>, vector<1x1x32xf32>,
    %c7_i32_306 = arith.constant 7 : i32
    %505 = arith.addi %0, %c7_i32_306 : i32
    %506 = arith.index_cast %505 : i32 to index
    %507 = memref.load %arg1[%506] : memref<16xi32, #tpu.memory_space<smem>>
    %508 = arith.index_cast %507 : i32 to index
    %c0_307 = arith.constant 0 : index
    %509 = vector.load %arg3[%508, %c0_307] : memref<64x32xf32, #tpu.memory_space<vmem>>, vector<1x32xf32>
    %c7_308 = arith.constant 7 : index
    %c0_309 = arith.constant 0 : index
    %510 = vector.load %arg6[%c7_308, %c0_309] : memref<8x32xf32, #tpu.memory_space<vmem>>, vector<1x32xf32>
    tpu.vector_store %arg6[%c7_308, %c0_309], %509 {strides = array<i32>} : memref<8x32xf32, #tpu.memory_space<vmem>>, vector<1x32xf32>,
    %c7_i32_310 = arith.constant 7 : i32
    %511 = arith.addi %0, %c7_i32_310 : i32
    %c8_i32_311 = arith.constant 8 : i32
    %512 = arith.muli %511, %c8_i32_311 : i32
    %c0_i32_312 = arith.constant 0 : i32
    %513 = arith.addi %512, %c0_i32_312 : i32
    %514 = arith.index_cast %513 : i32 to index
    %515 = memref.load %arg2[%514] : memref<128xi32, #tpu.memory_space<smem>>
    %516 = arith.index_cast %515 : i32 to index
    %c0_313 = arith.constant 0 : index
    %517 = vector.load %arg4[%516, %c0_313] : memref<256x32xf32, #tpu.memory_space<vmem>>, vector<1x32xf32>
    %c7_314 = arith.constant 7 : index
    %c0_315 = arith.constant 0 : index
    %c0_316 = arith.constant 0 : index
    %518 = vector.load %arg7[%c7_314, %c0_315, %c0_316] : memref<8x8x32xf32, #tpu.memory_space<vmem>>, vector<1x1x32xf32>
    %519 = vector.shape_cast %518 : vector<1x1x32xf32> to vector<1x32xf32>
    %520 = vector.shape_cast %517 : vector<1x32xf32> to vector<1x1x32xf32>
    tpu.vector_store %arg7[%c7_314, %c0_315, %c0_316], %520 {strides = array<i32>} : memref<8x8x32xf32, #tpu.memory_space<vmem>>, vector<1x1x32xf32>,
    %c1_i32_317 = arith.constant 1 : i32
    %521 = arith.addi %512, %c1_i32_317 : i32
    %522 = arith.index_cast %521 : i32 to index
    %523 = memref.load %arg2[%522] : memref<128xi32, #tpu.memory_space<smem>>
    %524 = arith.index_cast %523 : i32 to index
    %c0_318 = arith.constant 0 : index
    %525 = vector.load %arg4[%524, %c0_318] : memref<256x32xf32, #tpu.memory_space<vmem>>, vector<1x32xf32>
    %c7_319 = arith.constant 7 : index
    %c1_320 = arith.constant 1 : index
    %c0_321 = arith.constant 0 : index
    %526 = vector.load %arg7[%c7_319, %c1_320, %c0_321] : memref<8x8x32xf32, #tpu.memory_space<vmem>>, vector<1x1x32xf32>
    %527 = vector.shape_cast %526 : vector<1x1x32xf32> to vector<1x32xf32>
    %528 = vector.shape_cast %525 : vector<1x32xf32> to vector<1x1x32xf32>
    tpu.vector_store %arg7[%c7_319, %c1_320, %c0_321], %528 {strides = array<i32>} : memref<8x8x32xf32, #tpu.memory_space<vmem>>, vector<1x1x32xf32>,
    %c2_i32_322 = arith.constant 2 : i32
    %529 = arith.addi %512, %c2_i32_322 : i32
    %530 = arith.index_cast %529 : i32 to index
    %531 = memref.load %arg2[%530] : memref<128xi32, #tpu.memory_space<smem>>
    %532 = arith.index_cast %531 : i32 to index
    %c0_323 = arith.constant 0 : index
    %533 = vector.load %arg4[%532, %c0_323] : memref<256x32xf32, #tpu.memory_space<vmem>>, vector<1x32xf32>
    %c7_324 = arith.constant 7 : index
    %c2_325 = arith.constant 2 : index
    %c0_326 = arith.constant 0 : index
    %534 = vector.load %arg7[%c7_324, %c2_325, %c0_326] : memref<8x8x32xf32, #tpu.memory_space<vmem>>, vector<1x1x32xf32>
    %535 = vector.shape_cast %534 : vector<1x1x32xf32> to vector<1x32xf32>
    %536 = vector.shape_cast %533 : vector<1x32xf32> to vector<1x1x32xf32>
    tpu.vector_store %arg7[%c7_324, %c2_325, %c0_326], %536 {strides = array<i32>} : memref<8x8x32xf32, #tpu.memory_space<vmem>>, vector<1x1x32xf32>,
    %c3_i32_327 = arith.constant 3 : i32
    %537 = arith.addi %512, %c3_i32_327 : i32
    %538 = arith.index_cast %537 : i32 to index
    %539 = memref.load %arg2[%538] : memref<128xi32, #tpu.memory_space<smem>>
    %540 = arith.index_cast %539 : i32 to index
    %c0_328 = arith.constant 0 : index
    %541 = vector.load %arg4[%540, %c0_328] : memref<256x32xf32, #tpu.memory_space<vmem>>, vector<1x32xf32>
    %c7_329 = arith.constant 7 : index
    %c3_330 = arith.constant 3 : index
    %c0_331 = arith.constant 0 : index
    %542 = vector.load %arg7[%c7_329, %c3_330, %c0_331] : memref<8x8x32xf32, #tpu.memory_space<vmem>>, vector<1x1x32xf32>
    %543 = vector.shape_cast %542 : vector<1x1x32xf32> to vector<1x32xf32>
    %544 = vector.shape_cast %541 : vector<1x32xf32> to vector<1x1x32xf32>
    tpu.vector_store %arg7[%c7_329, %c3_330, %c0_331], %544 {strides = array<i32>} : memref<8x8x32xf32, #tpu.memory_space<vmem>>, vector<1x1x32xf32>,
    %c4_i32_332 = arith.constant 4 : i32
    %545 = arith.addi %512, %c4_i32_332 : i32
    %546 = arith.index_cast %545 : i32 to index
    %547 = memref.load %arg2[%546] : memref<128xi32, #tpu.memory_space<smem>>
    %548 = arith.index_cast %547 : i32 to index
    %c0_333 = arith.constant 0 : index
    %549 = vector.load %arg4[%548, %c0_333] : memref<256x32xf32, #tpu.memory_space<vmem>>, vector<1x32xf32>
    %c7_334 = arith.constant 7 : index
    %c4_335 = arith.constant 4 : index
    %c0_336 = arith.constant 0 : index
    %550 = vector.load %arg7[%c7_334, %c4_335, %c0_336] : memref<8x8x32xf32, #tpu.memory_space<vmem>>, vector<1x1x32xf32>
    %551 = vector.shape_cast %550 : vector<1x1x32xf32> to vector<1x32xf32>
    %552 = vector.shape_cast %549 : vector<1x32xf32> to vector<1x1x32xf32>
    tpu.vector_store %arg7[%c7_334, %c4_335, %c0_336], %552 {strides = array<i32>} : memref<8x8x32xf32, #tpu.memory_space<vmem>>, vector<1x1x32xf32>,
    %c5_i32_337 = arith.constant 5 : i32
    %553 = arith.addi %512, %c5_i32_337 : i32
    %554 = arith.index_cast %553 : i32 to index
    %555 = memref.load %arg2[%554] : memref<128xi32, #tpu.memory_space<smem>>
    %556 = arith.index_cast %555 : i32 to index
    %c0_338 = arith.constant 0 : index
    %557 = vector.load %arg4[%556, %c0_338] : memref<256x32xf32, #tpu.memory_space<vmem>>, vector<1x32xf32>
    %c7_339 = arith.constant 7 : index
    %c5_340 = arith.constant 5 : index
    %c0_341 = arith.constant 0 : index
    %558 = vector.load %arg7[%c7_339, %c5_340, %c0_341] : memref<8x8x32xf32, #tpu.memory_space<vmem>>, vector<1x1x32xf32>
    %559 = vector.shape_cast %558 : vector<1x1x32xf32> to vector<1x32xf32>
    %560 = vector.shape_cast %557 : vector<1x32xf32> to vector<1x1x32xf32>
    tpu.vector_store %arg7[%c7_339, %c5_340, %c0_341], %560 {strides = array<i32>} : memref<8x8x32xf32, #tpu.memory_space<vmem>>, vector<1x1x32xf32>,
    %c6_i32_342 = arith.constant 6 : i32
    %561 = arith.addi %512, %c6_i32_342 : i32
    %562 = arith.index_cast %561 : i32 to index
    %563 = memref.load %arg2[%562] : memref<128xi32, #tpu.memory_space<smem>>
    %564 = arith.index_cast %563 : i32 to index
    %c0_343 = arith.constant 0 : index
    %565 = vector.load %arg4[%564, %c0_343] : memref<256x32xf32, #tpu.memory_space<vmem>>, vector<1x32xf32>
    %c7_344 = arith.constant 7 : index
    %c6_345 = arith.constant 6 : index
    %c0_346 = arith.constant 0 : index
    %566 = vector.load %arg7[%c7_344, %c6_345, %c0_346] : memref<8x8x32xf32, #tpu.memory_space<vmem>>, vector<1x1x32xf32>
    %567 = vector.shape_cast %566 : vector<1x1x32xf32> to vector<1x32xf32>
    %568 = vector.shape_cast %565 : vector<1x32xf32> to vector<1x1x32xf32>
    tpu.vector_store %arg7[%c7_344, %c6_345, %c0_346], %568 {strides = array<i32>} : memref<8x8x32xf32, #tpu.memory_space<vmem>>, vector<1x1x32xf32>,
    %c7_i32_347 = arith.constant 7 : i32
    %569 = arith.addi %512, %c7_i32_347 : i32
    %570 = arith.index_cast %569 : i32 to index
    %571 = memref.load %arg2[%570] : memref<128xi32, #tpu.memory_space<smem>>
    %572 = arith.index_cast %571 : i32 to index
    %c0_348 = arith.constant 0 : index
    %573 = vector.load %arg4[%572, %c0_348] : memref<256x32xf32, #tpu.memory_space<vmem>>, vector<1x32xf32>
    %c7_349 = arith.constant 7 : index
    %c7_350 = arith.constant 7 : index
    %c0_351 = arith.constant 0 : index
    %574 = vector.load %arg7[%c7_349, %c7_350, %c0_351] : memref<8x8x32xf32, #tpu.memory_space<vmem>>, vector<1x1x32xf32>
    %575 = vector.shape_cast %574 : vector<1x1x32xf32> to vector<1x32xf32>
    %576 = vector.shape_cast %573 : vector<1x32xf32> to vector<1x1x32xf32>
    tpu.vector_store %arg7[%c7_349, %c7_350, %c0_351], %576 {strides = array<i32>} : memref<8x8x32xf32, #tpu.memory_space<vmem>>, vector<1x1x32xf32>,
    %c0_352 = arith.constant 0 : index
    %c0_353 = arith.constant 0 : index
    %577 = vector.load %arg6[%c0_352, %c0_353] : memref<8x32xf32, #tpu.memory_space<vmem>>, vector<8x32xf32>
    %c0_354 = arith.constant 0 : index
    %c0_355 = arith.constant 0 : index
    %c0_356 = arith.constant 0 : index
    %578 = vector.load %arg7[%c0_354, %c0_355, %c0_356] : memref<8x8x32xf32, #tpu.memory_space<vmem>>, vector<8x8x32xf32>
    %579 = vector.shape_cast %577 : vector<8x32xf32> to vector<8x1x32xf32>
    %580 = vector.broadcast %579 : vector<8x1x32xf32> to vector<8x8x32xf32>
    %581 = arith.mulf %578, %580 : vector<8x8x32xf32>
    %cst = arith.constant dense<0.000000e+00> : vector<8x8xf32>
    %582 = vector.multi_reduction <add>, %581, %cst [2] : vector<8x8x32xf32> to vector<8x8xf32>
    %c0_357 = arith.constant 0 : index
    %c0_358 = arith.constant 0 : index
    %583 = vector.load %arg5[%c0_357, %c0_358] : memref<8x8xf32, #tpu.memory_space<vmem>>, vector<8x8xf32>
    tpu.vector_store %arg5[%c0_357, %c0_358], %582 {strides = array<i32>} : memref<8x8xf32, #tpu.memory_space<vmem>>, vector<8x8xf32>,
    return
  }
  func.func @transform_0(%arg0: i32, %arg1: memref<16xi32, #tpu.memory_space<smem>>, %arg2: memref<128xi32, #tpu.memory_space<smem>>) -> (i32, i32) {
    %c0_i32 = arith.constant 0 : i32
    %c0_i32_0 = arith.constant 0 : i32
    %c0_i32_1 = arith.constant 0 : i32
    return %c0_i32, %c0_i32_0 : i32, i32
  }
  func.func @transform_1(%arg0: i32, %arg1: memref<16xi32, #tpu.memory_space<smem>>, %arg2: memref<128xi32, #tpu.memory_space<smem>>) -> (i32, i32) {
    %c0_i32 = arith.constant 0 : i32
    %c0_i32_0 = arith.constant 0 : i32
    %c0_i32_1 = arith.constant 0 : i32
    return %c0_i32, %c0_i32_0 : i32, i32
  }
  func.func @transform_2(%arg0: i32, %arg1: memref<16xi32, #tpu.memory_space<smem>>, %arg2: memref<128xi32, #tpu.memory_space<smem>>) -> (i32, i32) {
    %c0_i32 = arith.constant 0 : i32
    %c0_i32_0 = arith.constant 0 : i32
    return %arg0, %c0_i32 : i32, i32
  }
}

</mosaic_0001>

<bundles_post_ra>
// kernel: tpu_custom_call.1
= control target key start
LH: loop header
LB: loop body
LE: loop exit
PB: predicated region body
PF: predicated region fallthrough
CT: control target
= control target key end

     0   :  { %s1404_s0 = inlined_call_operand.vmem [shape: s32[16], index: 0, kind: input, shape index: {}]   ;;  %s1405_s2 = inlined_call_operand.vmem [shape: f32[64,32], index: 2, kind: input, shape index: {}]   ;;  %s1406_s3 = inlined_call_operand.vmem [shape: f32[256,32], index: 3, kind: input, shape index: {}]   ;;  %s1407_s4 = inlined_call_operand.vmem [shape: f32[16,8], index: 4, kind: output, shape index: {}]   ;;  %s1408_s1 = inlined_call_operand.vmem [shape: s32[128], index: 1, kind: input, shape index: {}]  }
   0x1   :  { %s9_s17 = sshll.u32 %s1404_s0, 4  ;;  %s13_s20 = sshll.u32 %s1408_s1, 4  ;;  %s10_s17 = int_to_ptr.vmem [resolvable:$true] %s9_s17  ;;  %s14_s20 = int_to_ptr.vmem [resolvable:$true] %s13_s20 }
   0x2   :  { %s855_s21 = scalar_lea.vmem %s10_s17, 16  ;;  %p860_p1 = scmp.lt.s32.totalorder %s10_s17, %s10_s17 }
   0x3   :  { %p856_p0 = scmp.ne.s32.totalorder %s10_s17, %s855_s21  ;;  %p861_p2 = scmp.lt.s32.totalorder %s855_s21, %s855_s21 }
   0x5   :  { %p862_p3 = por %p861_p2, %p860_p1 }
   0x7   :  { %p863_p4 = pnand %p862_p3, %p856_p0 }
   0x9   :  { %866 = shalt.err (!%p863_p4)  }
   0xa   :  { %s889_s22 = smov [#allocation5]   ;;  %s867_s23 = scalar_lea.vmem %s14_s20, 16 }
   0xb   :  { %12 = dma.vmem_to_smem %s10_s17, 16, %s889_s22, [#allocation4] }
   0xc   :  { %p868_p5 = scmp.ne.s32.totalorder %s14_s20, %s867_s23  ;;  %p872_p6 = scmp.lt.s32.totalorder %s14_s20, %s14_s20 }
   0xd   :  { %p873_p7 = scmp.lt.s32.totalorder %s867_s23, %s867_s23 }
   0xf   :  { %p874_p8 = por %p873_p7, %p872_p6 }
  0x11   :  { %p875_p9 = pnand %p874_p8, %p868_p5 }
  0x13   :  { %878 = shalt.err (!%p875_p9)  }
  0x14   :  { %s890_s0 = smov [#allocation6]  }
  0x15   :  { %16 = dma.vmem_to_smem %s14_s20, 16, %s890_s0, [#allocation4] }
  0x16   :  { %883 = dma.done.wait [#allocation4], 32 }
  0x17   :  { %884 = vsyncadd [#allocation4], 4294967264 }
  0x18   :  { %18 = sfence }
  0x19   :  { %s923_s1 = smov 0  }
  0x1a LB: > { %s929_s24 = sadd.s32 4294967295, %s887_s1   ;;  %p809_p10 = scmp.ge.s32.totalorder %s887_s1, 1  ;;  %s887_s1 = sphi %s923_s1, %s24_s1  }
  0x1b   : > { %p114_p11 = scmp.lt.s32.totalorder %s887_s1, 3 }
  0x1d   : > { %p115_p12 = pnand %p809_p10, %p114_p11 }
  0x1e   : > { %s934_s25 = sshll.u32 (!%p115_p12), %s929_s24, 3  ;;  %s937_s26 = sshll.u32 (!%p115_p12), %s929_s24, 6 }
  0x1f   : > { %118 = sbr.rel (%p115_p12) target bundleno = 297 (0x129), region = 28  ;;  %s135_s27 = sld [smem:[#allocation5 + %s934_s25]] (!%p115_p12) }
  0x20   : > { %s145_s28 = sadd.s32 (!%p115_p12), 1, %s937_s26  ;;  %s141_s29 = sld [smem:[#allocation6 + %s937_s26]] (!%p115_p12) }
  0x21   : > { %s150_s30 = sadd.s32 (!%p115_p12), 2, %s937_s26  ;;  %s146_s5 = sld [smem:[#allocation6 + %s145_s28]] (!%p115_p12) }
  0x22   : > { %s155_s6 = sadd.s32 (!%p115_p12), 3, %s937_s26  ;;  %s151_s7 = sld [smem:[#allocation6 + %s150_s30]] (!%p115_p12) }
  0x23   : > { %s160_s8 = sadd.s32 (!%p115_p12), 4, %s937_s26  ;;  %s156_s9 = sld [smem:[#allocation6 + %s155_s6]] (!%p115_p12) }
  0x24   : > { %v516_v0 = vlaneseq  ;;  %s165_s10 = sadd.s32 5, %s937_s26  ;;  %vm138_vm0 = vcmask 253952   ;;  %s161_s11 = sld [smem:[#allocation6 + %s160_s8]]  ;;  %v891_v18 = vmov 1966171168   ;;  %vm609_vm1 = vcmask 261120  }
  0x25   : > { %s170_s12 = sadd.s32 6, %s937_s26  ;;  %s136_s15 = scalar_lea.vmem %s1405_s2, %s135_s27  ;;  %v514_v19 = vunpack.c.l.s4 %v891_v18  ;;  %vm676_vm2 = vcmask 1041409   ;;  %vm678_vm3 = vcmask 1042434   ;;  %vm680_vm4 = vcmask 1043459  }
  0x26   : > { %v943_v1 = vshrl.u32 %v516_v0, 7  ;;  %v643_v2 = vand.u32 127, %v516_v0  ;;  %s166_s16 = sld [smem:[#allocation6 + %s165_s10]]  ;;  %v137_v4 = vld [vmem:[%s136_s15] sm:$0x1]  ;;  %s142_s19 = scalar_lea.vmem %s1406_s3, %s141_s29  ;;  %vm682_vm5 = vcmask 1044484  }
  0x27   : > { %s171_s20 = sld [smem:[#allocation6 + %s170_s12]]  ;;  %139 = vst.msk [vmem:[#allocation2] sm:$0x1] %vm138_vm0, %v137_v4  ;;  %v143_v5 = vld [vmem:[%s142_s19] sm:$0x1]  ;;  %s147_s23 = scalar_lea.vmem %s1406_s3, %s146_s5  ;;  %v515_v22 = vunpack.c.0.s8 %v514_v19  ;;  %vm684_vm6 = vcmask 1045509  }
  0x28   : > { %v948_v3 = vsub.s32 %v643_v2, %v943_v1  ;;  %s175_s0 = sadd.s32 7, %s937_s26  ;;  %144 = vst.msk [vmem:[#allocation3] sm:$0x1] %vm138_vm0, %v143_v5  ;;  %v148_v6 = vld [vmem:[%s147_s23] sm:$0x1]  ;;  %s152_s30 = scalar_lea.vmem %s1406_s3, %s151_s7  ;;  %v1077_v31 = vsub.s32 0, %v943_v1 }
  0x29   : > { %s176_s6 = sld [smem:[#allocation6 + %s175_s0]]  ;;  %149 = vst.msk [vmem:[#allocation3 + $0x1] sm:$0x1] %vm138_vm0, %v148_v6  ;;  %v153_v7 = vld [vmem:[%s152_s30] sm:$0x1]  ;;  %s157_s10 = scalar_lea.vmem %s1406_s3, %s156_s9  ;;  %v1047_v25 = vsub.s32 %v515_v22, %v943_v1  ;;  %vm686_vm7 = vcmask 1046534  }
  0x2a   : > { %s180_s12 = sadd.s32 1, %s934_s25  ;;  %154 = vst.msk [vmem:[#allocation3 + $0x2] sm:$0x1] %vm138_vm0, %v153_v7  ;;  %v158_v8 = vld [vmem:[%s157_s10] sm:$0x1]  ;;  %s162_s14 = scalar_lea.vmem %s1406_s3, %s161_s11  ;;  %vm688_vm8 = vcmask 1047559  }
  0x2b   : > { %s181_s15 = sld [smem:[#allocation5 + %s180_s12]]  ;;  %159 = vst.msk [vmem:[#allocation3 + $0x3] sm:$0x1] %vm138_vm0, %v158_v8  ;;  %v163_v9 = vld [vmem:[%s162_s14] sm:$0x1]  ;;  %s226_s9 = sadd.s32 2, %s934_s25 }
  0x2c   : > { %s167_s18 = scalar_lea.vmem %s1406_s3, %s166_s16  ;;  %164 = vst.msk [vmem:[#allocation3 + $0x4] sm:$0x1] %vm138_vm0, %v163_v9  ;;  %s227_s23 = sld [smem:[#allocation5 + %s226_s9]]  ;;  %vm691_vm9 = vcmask 64512  }
  0x2d   : > { %v168_v10 = vld [vmem:[%s167_s18] sm:$0x1]  ;;  %s172_s22 = scalar_lea.vmem %s1406_s3, %s171_s20  ;;  %s272_s11 = sadd.s32 3, %s934_s25 }
  0x2e   : > { %169 = vst.msk [vmem:[#allocation3 + $0x5] sm:$0x1] %vm138_vm0, %v168_v10  ;;  %v173_v11 = vld [vmem:[%s172_s22] sm:$0x1]  ;;  %s318_s0 = sadd.s32 4, %s934_s25  ;;  %s273_s30 = sld [smem:[#allocation5 + %s272_s11]] }
  0x2f   : > { %174 = vst.msk [vmem:[#allocation3 + $0x6] sm:$0x1] %vm138_vm0, %v173_v11  ;;  %s177_s28 = scalar_lea.vmem %s1406_s3, %s176_s6  ;;  %s319_s29 = sld [smem:[#allocation5 + %s318_s0]] }
  0x30   : > { %v178_v12 = vld [vmem:[%s177_s28] sm:$0x1]  ;;  %s364_s8 = sadd.s32 5, %s934_s25  ;;  %s410_s13 = sadd.s32 6, %s934_s25 }
  0x31   : > { %179 = vst.msk [vmem:[#allocation3 + $0x7] sm:$0x1] %vm138_vm0, %v178_v12  ;;  %s182_s12 = scalar_lea.vmem %s1405_s2, %s181_s15  ;;  %s365_s5 = sld [smem:[#allocation5 + %s364_s8]] }
  0x32   : > { %v183_v13 = vld [vmem:[%s182_s12] sm:$0x1]  ;;  %s456_s14 = sadd.s32 7, %s934_s25  ;;  %s228_s6 = scalar_lea.vmem %s1405_s2, %s227_s23 }
  0x33   : > { %184 = vst.msk [vmem:[#allocation2 + $0x1] sm:$0x1] %vm138_vm0, %v183_v13  ;;  %s411_s18 = sld [smem:[#allocation5 + %s410_s13]]  ;;  %v229_v14 = vld [vmem:[%s228_s6] sm:$0x1]  ;;  %s1004_s19 = sadd.s32 16, %s937_s26 }
  0x34   : > { %s457_s9 = sld [smem:[#allocation5 + %s456_s14]]  ;;  %230 = vst.msk [vmem:[#allocation2 + $0x2] sm:$0x1] %vm138_vm0, %v229_v14  ;;  %s274_s25 = scalar_lea.vmem %s1405_s2, %s273_s30 }
  0x35   : > { %s232_s22 = sld [smem:[#allocation6 + %s1004_s19]]  ;;  %v275_v15 = vld [vmem:[%s274_s25] sm:$0x1]  ;;  %s320_s23 = scalar_lea.vmem %s1405_s2, %s319_s29 }
  0x36   : > { %s237_s27 = sadd.s32 1, %s1004_s19  ;;  %276 = vst.msk [vmem:[#allocation2 + $0x3] sm:$0x1] %vm138_vm0, %v275_v15  ;;  %v321_v16 = vld [vmem:[%s320_s23] sm:$0x1]  ;;  %s242_s30 = sadd.s32 2, %s1004_s19 }
  0x37   : > { %s366_s8 = scalar_lea.vmem %s1405_s2, %s365_s5  ;;  %s238_s20 = sld [smem:[#allocation6 + %s237_s27]]  ;;  %322 = vst.msk [vmem:[#allocation2 + $0x4] sm:$0x1] %vm138_vm0, %v321_v16 }
  0x38   : > { %v367_v17 = vld [vmem:[%s366_s8] sm:$0x1]  ;;  %s247_s10 = sadd.s32 3, %s1004_s19  ;;  %s243_s14 = sld [smem:[#allocation6 + %s242_s30]]  ;;  %v503_v35 = vld [vmem:[#allocation3] sm:$0xff] }
  0x39   : > { %368 = vst.msk [vmem:[#allocation2 + $0x5] sm:$0x1] %vm138_vm0, %v367_v17  ;;  %s412_s13 = scalar_lea.vmem %s1405_s2, %s411_s18  ;;  %s248_s6 = sld [smem:[#allocation6 + %s247_s10]] }
  0x3a   : > { %v413_v20 = vld [vmem:[%s412_s13] sm:$0x1]  ;;  %s458_s17 = scalar_lea.vmem %s1405_s2, %s457_s9  ;;  %s252_s11 = sadd.s32 4, %s1004_s19 }
  0x3b   : > { %414 = vst.msk [vmem:[#allocation2 + $0x6] sm:$0x1] %vm138_vm0, %v413_v20  ;;  %v459_v21 = vld [vmem:[%s458_s17] sm:$0x1]  ;;  %s233_s25 = scalar_lea.vmem %s1406_s3, %s232_s22  ;;  %s253_s18 = sld [smem:[#allocation6 + %s252_s11]] }
  0x3c   : > { %460 = vst.msk [vmem:[#allocation2 + $0x7] sm:$0x1] %vm138_vm0, %v459_v21  ;;  %v234_v23 = vld [vmem:[%s233_s25] sm:$0x1]  ;;  %s257_s0 = sadd.s32 5, %s1004_s19  ;;  %s262_s28 = sadd.s32 6, %s1004_s19 }
  0x3d   : > { %236 = vst.msk [vmem:[#allocation3 + $0x10] sm:$0x1] %vm138_vm0, %v234_v23  ;;  %s239_s27 = scalar_lea.vmem %s1406_s3, %s238_s20  ;;  %s258_s16 = sld [smem:[#allocation6 + %s257_s0]] }
  0x3e   : > { %v240_v24 = vld [vmem:[%s239_s27] sm:$0x1]  ;;  %s267_s8 = sadd.s32 7, %s1004_s19  ;;  %s244_s10 = scalar_lea.vmem %s1406_s3, %s243_s14 }
  0x3f   : > { %241 = vst.msk [vmem:[#allocation3 + $0x11] sm:$0x1] %vm138_vm0, %v240_v24  ;;  %s263_s29 = sld [smem:[#allocation6 + %s262_s28]]  ;;  %v245_v26 = vld [vmem:[%s244_s10] sm:$0x1]  ;;  %s249_s7 = scalar_lea.vmem %s1406_s3, %s248_s6 }
  0x40   : > { %s268_s20 = sld [smem:[#allocation6 + %s267_s8]]  ;;  %246 = vst.msk [vmem:[#allocation3 + $0x12] sm:$0x1] %vm138_vm0, %v245_v26  ;;  %v250_v27 = vld [vmem:[%s249_s7] sm:$0x1]  ;;  %s1054_s19 = sadd.s32 8, %s937_s26 }
  0x41   : > { %s1057_s5 = sadd.s32 24, %s937_s26  ;;  %251 = vst.msk [vmem:[#allocation3 + $0x13] sm:$0x1] %vm138_vm0, %v250_v27  ;;  %s254_s15 = scalar_lea.vmem %s1406_s3, %s253_s18 }
  0x42   : > { %s1064_s21 = sld [smem:[#allocation6 + %s1054_s19]]  ;;  %v255_v29 = vld [vmem:[%s254_s15] sm:$0x1]  ;;  %s191_s0 = sadd.s32 1, %s1054_s19 }
  0x43   : > { %v1066_v28 = vld [vmem:[#allocation2] sm:$0xff]  ;;  %s259_s11 = scalar_lea.vmem %s1406_s3, %s258_s16  ;;  %256 = vst.msk [vmem:[#allocation3 + $0x14] sm:$0x1] %vm138_vm0, %v255_v29  ;;  %s192_s18 = sld [smem:[#allocation6 + %s191_s0]] }
  0x44   : > { %v1074_v30 = vrot.slane %v1066_v28, %v1047_v25  ;;  %v260_v32 = vld [vmem:[%s259_s11] sm:$0x1]  ;;  %s196_s9 = sadd.s32 2, %s1054_s19  ;;  %s201_s10 = sadd.s32 3, %s1054_s19  ;;  %v512_v9 = vcombine.high %v1066_v28, %v1066_v28 }
  0x45   : > { %261 = vst.msk [vmem:[#allocation3 + $0x15] sm:$0x1] %vm138_vm0, %v260_v32  ;;  %s264_s16 = scalar_lea.vmem %s1406_s3, %s263_s29  ;;  %s1085_s28 = sld [smem:[#allocation6 + %s196_s9]] }
  0x46   : > { %v535_v33 = vrot.slane %v1074_v30, %v1047_v25  ;;  %v265_v34 = vld [vmem:[%s264_s16] sm:$0x1]  ;;  %s269_s30 = scalar_lea.vmem %s1406_s3, %s268_s20  ;;  %s202_s12 = sld [smem:[#allocation6 + %s201_s10]]  ;;  %v527_v50 = vcombine.high %v1074_v30, %v1074_v30  ;;  %v526_v15 = vrot.slane %v512_v9, %v1047_v25 }
  0x47   : > { %266 = vst.msk [vmem:[#allocation3 + $0x16] sm:$0x1] %vm138_vm0, %v265_v34  ;;  %v270_v36 = vld [vmem:[%s269_s30] sm:$0x1]  ;;  %s206_s29 = sadd.s32 4, %s1054_s19  ;;  %s211_s20 = sadd.s32 5, %s1054_s19 }
  0x48   : > { %v564_v37 = vrot.slane %v535_v33, %v1077_v31  ;;  %271 = vst.msk [vmem:[#allocation3 + $0x17] sm:$0x1] %vm138_vm0, %v270_v36  ;;  %v557_v38 = vcombine.high %v535_v33, %v535_v33  ;;  %s187_s14 = scalar_lea.vmem %s1406_s3, %s1064_s21  ;;  %s207_s17 = sld [smem:[#allocation6 + %s206_s29]]  ;;  %v549_v55 = vrot.slane %v527_v50, %v1047_v25  ;;  %v1253_v20 = vrot.slane %v526_v15, %v1047_v25 }
  0x49   : > { %v188_v39 = vld [vmem:[%s187_s14] sm:$0x1]  ;;  %s216_s15 = sadd.s32 6, %s1054_s19  ;;  %s193_s11 = scalar_lea.vmem %s1406_s3, %s192_s18  ;;  %v528_v29 = vcombine.high %v526_v15, %v526_v15 }
  0x4a   : > { %v601_v40 = vmul.f32 %v564_v37, %v503_v35  ;;  %190 = vst.msk [vmem:[#allocation3 + $0x8] sm:$0x1] %vm138_vm0, %v188_v39  ;;  %s212_s0 = sld [smem:[#allocation6 + %s211_s20]]  ;;  %v194_v41 = vld [vmem:[%s193_s11] sm:$0x1]  ;;  %v572_v43 = vrot.slane %v557_v38, %v1077_v31  ;;  %s221_s16 = sadd.s32 7, %s1054_s19  ;;  %v568_v58 = vrot.slane %v549_v55, %v1077_v31  ;;  %v559_v4 = vcombine.high %v549_v55, %v549_v55 }
  0x4b   : > { %s198_s21 = scalar_lea.vmem %s1406_s3, %s1085_s28  ;;  %s1111_s27 = sld [smem:[#allocation6 + %s216_s15]]  ;;  %195 = vst.msk [vmem:[#allocation3 + $0x9] sm:$0x1] %vm138_vm0, %v194_v41  ;;  %v580_v23 = vrot.slane %v1253_v20, %v1077_v31  ;;  %v1300_v35 = vrot.slane %v528_v29, %v1047_v25 }
  0x4c   : > { %v610_v42 = vsel %vm609_vm1, %v601_v40, 0.0  ;;  %v199_v44 = vld [vmem:[%s198_s21] sm:$0x1]  ;;  %s1118_s8 = sld [smem:[#allocation6 + %s1057_s5]]  ;;  %s203_s28 = scalar_lea.vmem %s1406_s3, %s202_s12  ;;  %v576_v7 = vrot.slane %v559_v4, %v1077_v31 }
  0x4d   : > { %611 = vadd.xlane.f32.xlu0 %v610_v42  ;;  %200 = vst.msk [vmem:[#allocation3 + $0xa] sm:$0x1] %vm138_vm0, %v199_v44  ;;  %s222_s30 = sld [smem:[#allocation6 + %s221_s16]]  ;;  %v204_v45 = vld [vmem:[%s203_s28] sm:$0x1]  ;;  %s283_s7 = sadd.s32 1, %s1057_s5  ;;  %v584_v25 = vrot.slane %v1300_v35, %v1077_v31 }
  0x4e   : > { %s208_s13 = scalar_lea.vmem %s1406_s3, %s207_s17  ;;  %205 = vst.msk [vmem:[#allocation3 + $0xb] sm:$0x1] %vm138_vm0, %v204_v45  ;;  %s284_s19 = sld [smem:[#allocation6 + %s283_s7]] }
  0x4f   : > { %v505_v46 = vld [vmem:[#allocation3 + $0x10] sm:$0xff]  ;;  %v209_v47 = vld [vmem:[%s208_s13] sm:$0x1]  ;;  %s288_s14 = sadd.s32 2, %s1057_s5  ;;  %s293_s9 = sadd.s32 3, %s1057_s5 }
  0x50   : > { %v603_v48 = vmul.f32 %v572_v43, %v505_v46  ;;  %210 = vst.msk [vmem:[#allocation3 + $0xc] sm:$0x1] %vm138_vm0, %v209_v47  ;;  %s213_s15 = scalar_lea.vmem %s1406_s3, %s212_s0  ;;  %s289_s6 = sld [smem:[#allocation6 + %s288_s14]] }
  0x51   : > { %v214_v49 = vld [vmem:[%s213_s15] sm:$0x1]  ;;  %s218_s11 = scalar_lea.vmem %s1406_s3, %s1111_s27  ;;  %s294_s16 = sld [smem:[#allocation6 + %s293_s9]] }
  0x52   : > { %v616_v51 = vsel %vm609_vm1, %v603_v48, 0.0  ;;  %215 = vst.msk [vmem:[#allocation3 + $0xd] sm:$0x1] %vm138_vm0, %v214_v49  ;;  %v219_v52 = vld [vmem:[%s218_s11] sm:$0x1]  ;;  %s279_s0 = scalar_lea.vmem %s1406_s3, %s1118_s8  ;;  %s298_s28 = sadd.s32 4, %s1057_s5  ;;  %v558_v48 = vcombine.high %v1253_v20, %v1253_v20 }
  0x53   : > { %617 = vadd.xlane.f32.xlu1 %v616_v51  ;;  %220 = vst.msk [vmem:[#allocation3 + $0xe] sm:$0x1] %vm138_vm0, %v219_v52  ;;  %s223_s22 = scalar_lea.vmem %s1406_s3, %s222_s30  ;;  %v280_v53 = vld [vmem:[%s279_s0] sm:$0x1]  ;;  %s299_s10 = sld [smem:[#allocation6 + %s298_s28]] }
  0x54   : > { %v224_v54 = vld [vmem:[%s223_s22] sm:$0x1]  ;;  %282 = vst.msk [vmem:[#allocation3 + $0x18] sm:$0x1] %vm138_vm0, %v280_v53  ;;  %s303_s29 = sadd.s32 5, %s1057_s5  ;;  %s285_s7 = scalar_lea.vmem %s1406_s3, %s284_s19  ;;  %v588_v51 = vrot.slane %v558_v48, %v1077_v31 }
  0x55   : > { %225 = vst.msk [vmem:[#allocation3 + $0xf] sm:$0x1] %vm138_vm0, %v224_v54  ;;  %s304_s14 = sld [smem:[#allocation6 + %s303_s29]]  ;;  %v286_v56 = vld [vmem:[%s285_s7] sm:$0x1]  ;;  %s308_s15 = sadd.s32 6, %s1057_s5 }
  0x56   : > { %s290_s12 = scalar_lea.vmem %s1406_s3, %s289_s6  ;;  %287 = vst.msk [vmem:[#allocation3 + $0x19] sm:$0x1] %vm138_vm0, %v286_v56  ;;  %s309_s25 = sld [smem:[#allocation6 + %s308_s15]] }
  0x57   : > { %v291_v57 = vld [vmem:[%s290_s12] sm:$0x1]  ;;  %s313_s17 = sadd.s32 7, %s1057_s5  ;;  %s295_s23 = scalar_lea.vmem %s1406_s3, %s294_s16 }
  0x58   : > { %292 = vst.msk [vmem:[#allocation3 + $0x1a] sm:$0x1] %vm138_vm0, %v291_v57  ;;  %s314_s21 = sld [smem:[#allocation6 + %s313_s17]]  ;;  %v296_v59 = vld [vmem:[%s295_s23] sm:$0x1]  ;;  %s1171_s19 = sadd.s32 32, %s937_s26 }
  0x59   : > { %s1174_s6 = sadd.s32 40, %s937_s26  ;;  %297 = vst.msk [vmem:[#allocation3 + $0x1b] sm:$0x1] %vm138_vm0, %v296_v59  ;;  %s300_s27 = scalar_lea.vmem %s1406_s3, %s299_s10 }
  0x5a   : > { %s324_s18 = sld [smem:[#allocation6 + %s1171_s19]]  ;;  %v301_v60 = vld [vmem:[%s300_s27] sm:$0x1]  ;;  %s329_s29 = sadd.s32 1, %s1171_s19 }
  0x5b   : > { %s305_s28 = scalar_lea.vmem %s1406_s3, %s304_s14  ;;  %302 = vst.msk [vmem:[#allocation3 + $0x1c] sm:$0x1] %vm138_vm0, %v301_v60  ;;  %s330_s8 = sld [smem:[#allocation6 + %s329_s29]]  ;;  %v560_v60 = vcombine.high %v1300_v35, %v1300_v35 }
  0x5c   : > { %v504_v61 = vld [vmem:[#allocation3 + $0x8] sm:$0xff]  ;;  %v306_v62 = vld [vmem:[%s305_s28] sm:$0x1]  ;;  %s334_s13 = sadd.s32 2, %s1171_s19  ;;  %s310_s30 = scalar_lea.vmem %s1406_s3, %s309_s25 }
  0x5d   : > { %v602_v63 = vmul.f32 %v568_v58, %v504_v61  ;;  %307 = vst.msk [vmem:[#allocation3 + $0x1d] sm:$0x1] %vm138_vm0, %v306_v62  ;;  %s335_s20 = sld [smem:[#allocation6 + %s334_s13]]  ;;  %v311_v0 = vld [vmem:[%s310_s30] sm:$0x1]  ;;  %s339_s17 = sadd.s32 3, %s1171_s19  ;;  %v592_v61 = vrot.slane %v560_v60, %v1077_v31 }
  0x5e   : > { %s315_s15 = scalar_lea.vmem %s1406_s3, %s314_s21  ;;  %312 = vst.msk [vmem:[#allocation3 + $0x1e] sm:$0x1] %vm138_vm0, %v311_v0  ;;  %s340_s11 = sld [smem:[#allocation6 + %s339_s17]] }
  0x5f   : > { %v613_v1 = vsel %vm609_vm1, %v602_v63, 0.0  ;;  %v316_v2 = vld [vmem:[%s315_s15] sm:$0x1]  ;;  %s344_s9 = sadd.s32 4, %s1171_s19  ;;  %s349_s21 = sadd.s32 5, %s1171_s19 }
  0x60   : > { %614 = vadd.xlane.f32.xlu0 %v613_v1  ;;  %317 = vst.msk [vmem:[#allocation3 + $0x1f] sm:$0x1] %vm138_vm0, %v316_v2  ;;  %s325_s5 = scalar_lea.vmem %s1406_s3, %s324_s18  ;;  %s345_s0 = sld [smem:[#allocation6 + %s344_s9]] }
  0x61   : > { %v326_v5 = vld [vmem:[%s325_s5] sm:$0x1]  ;;  %s354_s27 = sadd.s32 6, %s1171_s19  ;;  %s331_s28 = scalar_lea.vmem %s1406_s3, %s330_s8 }
  0x62   : > { %328 = vst.msk [vmem:[#allocation3 + $0x20] sm:$0x1] %vm138_vm0, %v326_v5  ;;  %s350_s29 = sld [smem:[#allocation6 + %s349_s21]]  ;;  %v332_v6 = vld [vmem:[%s331_s28] sm:$0x1]  ;;  %s359_s18 = sadd.s32 7, %s1171_s19 }
  0x63   : > { %s336_s10 = scalar_lea.vmem %s1406_s3, %s335_s20  ;;  %s355_s30 = sld [smem:[#allocation6 + %s354_s27]]  ;;  %333 = vst.msk [vmem:[#allocation3 + $0x21] sm:$0x1] %vm138_vm0, %v332_v6 }
  0x64   : > { %v337_v8 = vld [vmem:[%s336_s10] sm:$0x1]  ;;  %s1215_s14 = sld [smem:[#allocation6 + %s1174_s6]]  ;;  %s341_s15 = scalar_lea.vmem %s1406_s3, %s340_s11 }
  0x65   : > { %338 = vst.msk [vmem:[#allocation3 + $0x22] sm:$0x1] %vm138_vm0, %v337_v8  ;;  %s360_s20 = sld [smem:[#allocation6 + %s359_s18]]  ;;  %v342_v10 = vld [vmem:[%s341_s15] sm:$0x1]  ;;  %s375_s23 = sadd.s32 1, %s1174_s6 }
  0x66   : > { %s346_s25 = scalar_lea.vmem %s1406_s3, %s345_s0  ;;  %343 = vst.msk [vmem:[#allocation3 + $0x23] sm:$0x1] %vm138_vm0, %v342_v10  ;;  %s376_s19 = sld [smem:[#allocation6 + %s375_s23]] }
  0x67   : > { %v506_v11 = vld [vmem:[#allocation3 + $0x18] sm:$0xff]  ;;  %s380_s5 = sadd.s32 2, %s1174_s6  ;;  %s385_s13 = sadd.s32 3, %s1174_s6 }
  0x68   : > { %v347_v12 = vld [vmem:[%s346_s25] sm:$0x1]  ;;  %v604_v13 = vmul.f32 %v576_v7, %v506_v11  ;;  %s351_s27 = scalar_lea.vmem %s1406_s3, %s350_s29  ;;  %s381_s16 = sld [smem:[#allocation6 + %s380_s5]] }
  0x69   : > { %348 = vst.msk [vmem:[#allocation3 + $0x24] sm:$0x1] %vm138_vm0, %v347_v12  ;;  %v352_v14 = vld [vmem:[%s351_s27] sm:$0x1]  ;;  %s356_s28 = scalar_lea.vmem %s1406_s3, %s355_s30  ;;  %s386_s29 = sld [smem:[#allocation6 + %s385_s13]] }
  0x6a   : > { %v619_v16 = vsel %vm609_vm1, %v604_v13, 0.0  ;;  %353 = vst.msk [vmem:[#allocation3 + $0x25] sm:$0x1] %vm138_vm0, %v352_v14  ;;  %v357_v17 = vld [vmem:[%s356_s28] sm:$0x1]  ;;  %s371_s18 = scalar_lea.vmem %s1406_s3, %s1215_s14  ;;  %s390_s15 = sadd.s32 4, %s1174_s6 }
  0x6b   : > { %620 = vadd.xlane.f32.xlu1 %v619_v16  ;;  %358 = vst.msk [vmem:[#allocation3 + $0x26] sm:$0x1] %vm138_vm0, %v357_v17  ;;  %s361_s12 = scalar_lea.vmem %s1406_s3, %s360_s20  ;;  %v372_v18 = vld [vmem:[%s371_s18] sm:$0x1]  ;;  %s391_s17 = sld [smem:[#allocation6 + %s390_s15]] }
  0x6c   : > { %v362_v19 = vld [vmem:[%s361_s12] sm:$0x1]  ;;  %374 = vst.msk [vmem:[#allocation3 + $0x28] sm:$0x1] %vm138_vm0, %v372_v18  ;;  %s395_s9 = sadd.s32 5, %s1174_s6  ;;  %s377_s23 = scalar_lea.vmem %s1406_s3, %s376_s19 }
  0x6d   : > { %363 = vst.msk [vmem:[#allocation3 + $0x27] sm:$0x1] %vm138_vm0, %v362_v19  ;;  %s396_s20 = sld [smem:[#allocation6 + %s395_s9]]  ;;  %v378_v21 = vld [vmem:[%s377_s23] sm:$0x1]  ;;  %s400_s27 = sadd.s32 6, %s1174_s6 }
  0x6e   : > { %s382_s11 = scalar_lea.vmem %s1406_s3, %s381_s16  ;;  %379 = vst.msk [vmem:[#allocation3 + $0x29] sm:$0x1] %vm138_vm0, %v378_v21  ;;  %s401_s22 = sld [smem:[#allocation6 + %s400_s27]] }
  0x6f   : > { %v383_v22 = vld [vmem:[%s382_s11] sm:$0x1]  ;;  %s405_s0 = sadd.s32 7, %s1174_s6  ;;  %s387_s7 = scalar_lea.vmem %s1406_s3, %s386_s29 }
  0x70   : > { %384 = vst.msk [vmem:[#allocation3 + $0x2a] sm:$0x1] %vm138_vm0, %v383_v22  ;;  %s406_s10 = sld [smem:[#allocation6 + %s405_s0]]  ;;  %v388_v24 = vld [vmem:[%s387_s7] sm:$0x1]  ;;  %s1271_s19 = sadd.s32 48, %s937_s26 }
  0x71   : > { %s1274_s16 = sadd.s32 56, %s937_s26  ;;  %389 = vst.msk [vmem:[#allocation3 + $0x2b] sm:$0x1] %vm138_vm0, %v388_v24  ;;  %s392_s8 = scalar_lea.vmem %s1406_s3, %s391_s17 }
  0x72   : > { %s416_s30 = sld [smem:[#allocation6 + %s1271_s19]]  ;;  %v393_v26 = vld [vmem:[%s392_s8] sm:$0x1]  ;;  %s421_s9 = sadd.s32 1, %s1271_s19 }
  0x73   : > { %s397_s15 = scalar_lea.vmem %s1406_s3, %s396_s20  ;;  %394 = vst.msk [vmem:[#allocation3 + $0x2c] sm:$0x1] %vm138_vm0, %v393_v26  ;;  %s422_s26 = sld [smem:[#allocation6 + %s421_s9]] }
  0x74   : > { %v507_v27 = vld [vmem:[#allocation3 + $0x20] sm:$0xff]  ;;  %v398_v28 = vld [vmem:[%s397_s15] sm:$0x1]  ;;  %s426_s14 = sadd.s32 2, %s1271_s19  ;;  %s402_s23 = scalar_lea.vmem %s1406_s3, %s401_s22 }
  0x75   : > { %v605_v30 = vmul.f32 %v580_v23, %v507_v27  ;;  %399 = vst.msk [vmem:[#allocation3 + $0x2d] sm:$0x1] %vm138_vm0, %v398_v28  ;;  %s427_s5 = sld [smem:[#allocation6 + %s426_s14]]  ;;  %v403_v32 = vld [vmem:[%s402_s23] sm:$0x1]  ;;  %s431_s27 = sadd.s32 3, %s1271_s19 }
  0x76   : > { %s407_s11 = scalar_lea.vmem %s1406_s3, %s406_s10  ;;  %404 = vst.msk [vmem:[#allocation3 + $0x2e] sm:$0x1] %vm138_vm0, %v403_v32  ;;  %s432_s0 = sld [smem:[#allocation6 + %s431_s27]] }
  0x77   : > { %v622_v33 = vsel %vm609_vm1, %v605_v30, 0.0  ;;  %v408_v34 = vld [vmem:[%s407_s11] sm:$0x1]  ;;  %s436_s28 = sadd.s32 4, %s1271_s19  ;;  %s441_s6 = sadd.s32 5, %s1271_s19 }
  0x78   : > { %623 = vadd.xlane.f32.xlu0 %v622_v33  ;;  %409 = vst.msk [vmem:[#allocation3 + $0x2f] sm:$0x1] %vm138_vm0, %v408_v34  ;;  %s417_s7 = scalar_lea.vmem %s1406_s3, %s416_s30  ;;  %s437_s10 = sld [smem:[#allocation6 + %s436_s28]] }
  0x79   : > { %v418_v36 = vld [vmem:[%s417_s7] sm:$0x1]  ;;  %s446_s18 = sadd.s32 6, %s1271_s19  ;;  %s423_s12 = scalar_lea.vmem %s1406_s3, %s422_s26 }
  0x7a   : > { %420 = vst.msk [vmem:[#allocation3 + $0x30] sm:$0x1] %vm138_vm0, %v418_v36  ;;  %s442_s15 = sld [smem:[#allocation6 + %s441_s6]]  ;;  %v424_v37 = vld [vmem:[%s423_s12] sm:$0x1]  ;;  %s451_s30 = sadd.s32 7, %s1271_s19 }
  0x7b   : > { %s428_s17 = scalar_lea.vmem %s1406_s3, %s427_s5  ;;  %s447_s25 = sld [smem:[#allocation6 + %s446_s18]]  ;;  %425 = vst.msk [vmem:[#allocation3 + $0x31] sm:$0x1] %vm138_vm0, %v424_v37 }
  0x7c   : > { %v429_v38 = vld [vmem:[%s428_s17] sm:$0x1]  ;;  %s462_s23 = sld [smem:[#allocation6 + %s1274_s16]]  ;;  %s433_s21 = scalar_lea.vmem %s1406_s3, %s432_s0 }
  0x7d   : > { %430 = vst.msk [vmem:[#allocation3 + $0x32] sm:$0x1] %vm138_vm0, %v429_v38  ;;  %s452_s11 = sld [smem:[#allocation6 + %s451_s30]]  ;;  %v434_v39 = vld [vmem:[%s433_s21] sm:$0x1]  ;;  %s467_s22 = sadd.s32 1, %s1274_s16 }
  0x7e   : > { %s438_s28 = scalar_lea.vmem %s1406_s3, %s437_s10  ;;  %435 = vst.msk [vmem:[#allocation3 + $0x33] sm:$0x1] %vm138_vm0, %v434_v39  ;;  %s468_s19 = sld [smem:[#allocation6 + %s467_s22]] }
  0x7f   : > { %v508_v40 = vld [vmem:[#allocation3 + $0x28] sm:$0xff]  ;;  %v439_v41 = vld [vmem:[%s438_s28] sm:$0x1]  ;;  %s472_s13 = sadd.s32 2, %s1274_s16  ;;  %s477_s12 = sadd.s32 3, %s1274_s16 }
  0x80   : > { %v606_v42 = vmul.f32 %v584_v25, %v508_v40  ;;  %440 = vst.msk [vmem:[#allocation3 + $0x34] sm:$0x1] %vm138_vm0, %v439_v41  ;;  %s443_s6 = scalar_lea.vmem %s1406_s3, %s442_s15  ;;  %s473_s18 = sld [smem:[#allocation6 + %s472_s13]] }
  0x81   : > { %v444_v43 = vld [vmem:[%s443_s6] sm:$0x1]  ;;  %s448_s10 = scalar_lea.vmem %s1406_s3, %s447_s25  ;;  %s478_s30 = sld [smem:[#allocation6 + %s477_s12]] }
  0x82   : > { %v625_v44 = vsel %vm609_vm1, %v606_v42, 0.0  ;;  %445 = vst.msk [vmem:[#allocation3 + $0x35] sm:$0x1] %vm138_vm0, %v444_v43  ;;  %v449_v45 = vld [vmem:[%s448_s10] sm:$0x1]  ;;  %s463_s17 = scalar_lea.vmem %s1406_s3, %s462_s23  ;;  %s482_s25 = sadd.s32 4, %s1274_s16 }
  0x83   : > { %626 = vadd.xlane.f32.xlu1 %v625_v44  ;;  %450 = vst.msk [vmem:[#allocation3 + $0x36] sm:$0x1] %vm138_vm0, %v449_v45  ;;  %s453_s26 = scalar_lea.vmem %s1406_s3, %s452_s11  ;;  %v464_v46 = vld [vmem:[%s463_s17] sm:$0x1]  ;;  %s483_s21 = sld [smem:[#allocation6 + %s482_s25]] }
  0x84   : > { %v454_v47 = vld [vmem:[%s453_s26] sm:$0x1]  ;;  %466 = vst.msk [vmem:[#allocation3 + $0x38] sm:$0x1] %vm138_vm0, %v464_v46  ;;  %s487_s5 = sadd.s32 5, %s1274_s16  ;;  %s469_s28 = scalar_lea.vmem %s1406_s3, %s468_s19 }
  0x85   : > { %455 = vst.msk [vmem:[#allocation3 + $0x37] sm:$0x1] %vm138_vm0, %v454_v47  ;;  %s488_s22 = sld [smem:[#allocation6 + %s487_s5]]  ;;  %v470_v49 = vld [vmem:[%s469_s28] sm:$0x1]  ;;  %s492_s0 = sadd.s32 6, %s1274_s16 }
  0x86   : > { %s474_s7 = scalar_lea.vmem %s1406_s3, %s473_s18  ;;  %471 = vst.msk [vmem:[#allocation3 + $0x39] sm:$0x1] %vm138_vm0, %v470_v49  ;;  %s493_s6 = sld [smem:[#allocation6 + %s492_s0]] }
  0x87   : > { %v475_v50 = vld [vmem:[%s474_s7] sm:$0x1]  ;;  %s497_s8 = sadd.s32 7, %s1274_s16  ;;  %s479_s12 = scalar_lea.vmem %s1406_s3, %s478_s30 }
  0x88   : > { %476 = vst.msk [vmem:[#allocation3 + $0x3a] sm:$0x1] %vm138_vm0, %v475_v50  ;;  %s498_s9 = sld [smem:[#allocation6 + %s497_s8]]  ;;  %v480_v52 = vld [vmem:[%s479_s12] sm:$0x1]  ;;  %p130_p13 = scmp.lt.s32.totalorder %s929_s24, 1 }
  0x89   : > { %481 = vst.msk [vmem:[#allocation3 + $0x3b] sm:$0x1] %vm138_vm0, %v480_v52  ;;  %s484_s14 = scalar_lea.vmem %s1406_s3, %s483_s21 }
  0x8a   : > { %v485_v53 = vld [vmem:[%s484_s14] sm:$0x1]  ;;  %s1410_s24 = smov (!%p130_p13, %s929_s24), 1 }
  0x8b   : > { %s489_s16 = scalar_lea.vmem %s1406_s3, %s488_s22  ;;  %486 = vst.msk [vmem:[#allocation3 + $0x3c] sm:$0x1] %vm138_vm0, %v485_v53  ;;  %s810_s23 = sshll.u32 %s1410_s24, 3 }
  0x8c   : > { %v509_v54 = vld [vmem:[#allocation3 + $0x30] sm:$0xff]  ;;  %v490_v55 = vld [vmem:[%s489_s16] sm:$0x1]  ;;  %s494_s26 = scalar_lea.vmem %s1406_s3, %s493_s6  ;;  %s133_s22 = scalar_lea.vmem %s1407_s4, %s810_s23 }
  0x8d   : > { %v607_v56 = vmul.f32 %v588_v51, %v509_v54  ;;  %491 = vst.msk [vmem:[#allocation3 + $0x3d] sm:$0x1] %vm138_vm0, %v490_v55  ;;  %v495_v57 = vld [vmem:[%s494_s26] sm:$0x1] }
  0x8e   : > { %s499_s21 = scalar_lea.vmem %s1406_s3, %s498_s9  ;;  %496 = vst.msk [vmem:[#allocation3 + $0x3e] sm:$0x1] %vm138_vm0, %v495_v57 }
  0x8f   : > { %v628_v58 = vsel %vm609_vm1, %v607_v56, 0.0  ;;  %v500_v59 = vld [vmem:[%s499_s21] sm:$0x1] }
  0x90   : > { %629 = vadd.xlane.f32.xlu0 %v628_v58  ;;  %501 = vst.msk [vmem:[#allocation3 + $0x3f] sm:$0x1] %vm138_vm0, %v500_v59 }
  0x97   : > { %v510_v62 = vld [vmem:[#allocation3 + $0x38] sm:$0xff] }
  0x98   : > { %v608_v63 = vmul.f32 %v592_v61, %v510_v62 }
  0x9a   : > { %v631_v0 = vsel %vm609_vm1, %v608_v63, 0.0 }
  0x9b   : > { %632 = vadd.xlane.f32.xlu1 %v631_v0 }
  0xd6   : > { %v612_v1 = vpop.xlane.xlu0 %611 }
  0xd7   : > { %v647_v6 = vrot.slane %v612_v1, %v948_v3 }
  0xdc   : > { %v618_v2 = vpop.xlane.xlu1 %617 }
  0xdd   : > { %v655_v31 = vrot.slane %v618_v2, %v948_v3 }
  0xe9   : > { %v615_v4 = vpop.xlane.xlu0 %614 }
  0xea   : > { %v651_v5 = vrot.slane %v615_v4, %v948_v3 }
  0xec   : > { %v677_v8 = vsel %vm676_vm2, %v651_v5, %v647_v6 }
  0xed   : > { %v679_v11 = vsel %vm678_vm3, %v655_v31, %v677_v8 }
  0xf4   : > { %v621_v7 = vpop.xlane.xlu1 %620 }
  0xf5   : > { %v659_v9 = vrot.slane %v621_v7, %v948_v3 }
  0xf7   : > { %v681_v14 = vsel %vm680_vm4, %v659_v9, %v679_v11 }
 0x101   : > { %v624_v10 = vpop.xlane.xlu0 %623 }
 0x102   : > { %v663_v12 = vrot.slane %v624_v10, %v948_v3 }
 0x104   : > { %v683_v17 = vsel %vm682_vm5, %v663_v12, %v681_v14 }
 0x10c   : > { %v627_v13 = vpop.xlane.xlu1 %626 }
 0x10d   : > { %v667_v15 = vrot.slane %v627_v13, %v948_v3 }
 0x10f   : > { %v685_v19 = vsel %vm684_vm6, %v667_v15, %v683_v17 }
 0x119   : > { %v630_v16 = vpop.xlane.xlu0 %629 }
 0x11a   : > { %v671_v18 = vrot.slane %v630_v16, %v948_v3 }
 0x11c   : > { %v687_v20 = vsel %vm686_vm7, %v671_v18, %v685_v19 }
 0x124   : > { %v633_v21 = vpop.xlane.xlu1 %632 }
 0x125   : > { %v675_v22 = vrot.slane %v633_v21, %v948_v3 }
 0x127   : > { %v689_v23 = vsel %vm688_vm8, %v675_v22, %v687_v20 }
 0x128   : > { %692 = vst.msk [vmem:[%s133_s22] sm:$0xff] %vm691_vm9, %v689_v23 }
 0x129 PF: > { %s24_s1 = sadd.s32 1, %s887_s1  }
 0x12a   : > { %p21_p0 = scmp.ge.s32.totalorder %s24_s1, 4  }
 0x12c   :  { %23 = sbr.rel (!%p21_p0) target bundleno = 26 (0x1a), region = 134 }

</bundles_post_ra>
